<compile_context>
chip_gen: v7x
topology: tpu7x:2x2x1
jax: 0.10.0
libtpu: 0.0.40
codegen_flags: <defaults>
</compile_context>

<pallas_src>
import functools

import jax
import jax.numpy as jnp
from jax.experimental import pallas as pl
from jax.experimental.pallas import tpu as pltpu


# ----------------------------------------------------------------------------
# Fused GaussConvNet kernel: ALL GaussBlack levels for one (batch, node) row.
# Per level:  conv1(weight-norm folded, dilated, causal)+chomp+tanh
#             conv2(...)+chomp+tanh, 1x1 downsample residual, ReLU.
# Layout is node-major (B, N, C, T): time on lanes, channels on sublanes.
# ----------------------------------------------------------------------------
def _tcn_stack_kernel(*refs, ks, dilations, n_levels):
    x_ref = refs[0]
    lvl_refs = refs[1:1 + 6 * n_levels]
    o_ref = refs[1 + 6 * n_levels]
    stage_refs = refs[2 + 6 * n_levels:]           # 2 VMEM staging bufs per level

    T = x_ref.shape[-1]
    cur = x_ref[...].astype(jnp.float32)           # (C_in0, T)

    for l in range(n_levels):                      # static unroll over levels
        w1, b1, w2, b2, wd, bd = lvl_refs[6 * l:6 * (l + 1)]
        s_in, s_mid = stage_refs[2 * l], stage_refs[2 * l + 1]
        d = dilations[l]
        pad = (ks - 1) * d
        c_out = w1.shape[1]

        # conv1: causal left pad staged in VMEM; chomp fused (only first T cols).
        s_in[:, :pad] = jnp.zeros((s_in.shape[0], pad), jnp.float32)
        s_in[:, pad:] = cur
        acc = jnp.zeros((c_out, T), jnp.float32)
        for j in range(ks):                        # static unroll over taps
            off = j * d
            acc = acc + jnp.dot(w1[j], s_in[:, off:off + T],
                                preferred_element_type=jnp.float32)
        h1 = jnp.tanh(acc + b1[...])
        # TODO(synk): dropout1/dropout2 are train-time ops; forward is inference
        # mode where they are identities.

        # conv2 + fused chomp + tanh
        s_mid[:, :pad] = jnp.zeros((c_out, pad), jnp.float32)
        s_mid[:, pad:] = h1
        acc = jnp.zeros((c_out, T), jnp.float32)
        for j in range(ks):
            off = j * d
            acc = acc + jnp.dot(w2[j], s_mid[:, off:off + T],
                                preferred_element_type=jnp.float32)
        h2 = jnp.tanh(acc + b2[...])

        # 1x1 downsample residual + ReLU
        res = jnp.dot(wd[...], cur, preferred_element_type=jnp.float32) + bd[...]
        cur = jnp.maximum(h2 + res, 0.0)

    o_ref[...] = cur.astype(o_ref.dtype)


def tcn_stack(x, levels, *, ks):
    """Full GaussConvNet. x: (B, N, C_in0, T) -> (B, N, C_last, T)."""
    assert ks >= 2, "kernel_size must be >= 2 (chomp_size would be 0 otherwise)"
    B, N, C0, T = x.shape
    n_levels = len(levels)
    dilations = tuple(2 ** l for l in range(n_levels))
    c_last = levels[-1]["w1"].shape[1]

    args = [x]
    in_specs = [pl.BlockSpec((None, None, C0, T), lambda b, n: (b, n, 0, 0))]
    scratch = []
    c_prev = C0
    for l, lp in enumerate(levels):
        c_out = lp["w1"].shape[1]
        pad = (ks - 1) * dilations[l]
        args += [lp["w1"], lp["b1"].reshape(c_out, 1),
                 lp["w2"], lp["b2"].reshape(c_out, 1),
                 lp["wd"], lp["bd"].reshape(c_out, 1)]
        in_specs += [
            pl.BlockSpec((ks, c_out, c_prev), lambda b, n: (0, 0, 0)),
            pl.BlockSpec((c_out, 1), lambda b, n: (0, 0)),
            pl.BlockSpec((ks, c_out, c_out), lambda b, n: (0, 0, 0)),
            pl.BlockSpec((c_out, 1), lambda b, n: (0, 0)),
            pl.BlockSpec((c_out, c_prev), lambda b, n: (0, 0)),
            pl.BlockSpec((c_out, 1), lambda b, n: (0, 0)),
        ]
        scratch += [pltpu.VMEM((c_prev, T + pad), jnp.float32),
                    pltpu.VMEM((c_out, T + pad), jnp.float32)]
        c_prev = c_out

    kernel = functools.partial(_tcn_stack_kernel, ks=ks, dilations=dilations,
                               n_levels=n_levels)
    return pl.pallas_call(
        kernel,
        out_shape=jax.ShapeDtypeStruct((B, N, c_last, T), x.dtype),
        grid_spec=pltpu.PrefetchScalarGridSpec(
            num_scalar_prefetch=0,
            grid=(B, N),
            in_specs=in_specs,
            out_specs=pl.BlockSpec((None, None, c_last, T),
                                   lambda b, n: (b, n, 0, 0)),
            scratch_shapes=scratch,
        ),
        compiler_params=pltpu.CompilerParams(
            dimension_semantics=("parallel", "parallel")),
    )(*args)


# ----------------------------------------------------------------------------
# Fused SpatioConvBlack kernel: graph conv (Chebyshev-style) + bias + residual
# + ReLU + p_f periodicity scaling, per (batch, node) grid point, built from
# plain 2-D MXU matmuls (the 'binkt' intermediate is never written to HBM).
# ----------------------------------------------------------------------------
def _spatio_pf_kernel(x_all_ref, x_res_ref, lk_ref, theta_ref, b_ref, pf_ref,
                      o_ref, *, c_in):
    # x_all_ref: (C, M, T) whole per-batch slab, x_res_ref: (C, T) residual row,
    # lk_ref: (Ks, M) rows of Lk for this output node, theta_ref: (C_in, C_out, Ks),
    # pf_ref: (C, T) periodicity factors (the module's broadcast indexes p_f by
    # the channel axis, requiring num_channels[-1] == batch).
    lk_n = lk_ref[...]
    acc = jnp.zeros(o_ref.shape, jnp.float32)            # (C_out, T)
    for i in range(c_in):                                # static unroll
        xc_i = jnp.dot(lk_n, x_all_ref[i],
                       preferred_element_type=jnp.float32)          # (Ks, T)
        acc = acc + jnp.dot(theta_ref[i], xc_i,
                            preferred_element_type=jnp.float32)     # (C_out, T)
    out = acc + b_ref[...] + x_res_ref[...]
    o_ref[...] = (pf_ref[...] * jnp.maximum(out, 0.0)).astype(o_ref.dtype)


def spatio_conv_pf(x_nchw, x_node, Lk, theta, b_s, p_f):
    """x_nchw: (B,C,M,T), x_node: (B,M,C,T), p_f: (C,T) -> (B, M, C, T)."""
    B, C, M, T = x_nchw.shape
    Ks = Lk.shape[0]
    # Exact replication of the PyTorch broadcast p_f.unsqueeze(1)*(B,C,N,T),
    # which aligns p_f's leading dim with the channel axis (requires B == C).
    assert p_f.shape == (C, T), (
        "GTCN's p_f broadcast requires num_channels[-1] == batch")
    Lk_t = jnp.transpose(Lk, (1, 0, 2))                  # (M, Ks, M) per-node rows
    kernel = functools.partial(_spatio_pf_kernel, c_in=C)
    return pl.pallas_call(
        kernel,
        out_shape=jax.ShapeDtypeStruct((B, M, C, T), x_nchw.dtype),
        grid_spec=pltpu.PrefetchScalarGridSpec(
            num_scalar_prefetch=0,
            grid=(B, M),
            in_specs=[
                pl.BlockSpec((None, C, M, T), lambda b, n: (b, 0, 0, 0)),
                pl.BlockSpec((None, None, C, T), lambda b, n: (b, n, 0, 0)),
                pl.BlockSpec((None, Ks, M), lambda b, n: (n, 0, 0)),
                pl.BlockSpec((C, C, Ks), lambda b, n: (0, 0, 0)),
                pl.BlockSpec((C, 1), lambda b, n: (0, 0)),
                pl.BlockSpec((C, T), lambda b, n: (0, 0)),
            ],
            out_specs=pl.BlockSpec((None, None, C, T), lambda b, n: (b, n, 0, 0)),
        ),
        compiler_params=pltpu.CompilerParams(
            dimension_semantics=("parallel", "parallel")),
    )(x_nchw, x_node, Lk_t, theta, b_s.reshape(C, 1), p_f)


# ----------------------------------------------------------------------------
# Final Linear as a single-block MXU matmul kernel.
# ----------------------------------------------------------------------------
def _linear_kernel(x_ref, w_ref, b_ref, o_ref):
    o_ref[...] = (jnp.dot(x_ref[...], w_ref[...],
                          preferred_element_type=jnp.float32)
                  + b_ref[...]).astype(o_ref.dtype)


def linear_pallas(x2, w, b):
    R, K = x2.shape
    O = w.shape[1]
    return pl.pallas_call(
        _linear_kernel,
        out_shape=jax.ShapeDtypeStruct((R, O), x2.dtype),
        grid_spec=pltpu.PrefetchScalarGridSpec(
            num_scalar_prefetch=0,
            grid=(1,),
            in_specs=[
                pl.BlockSpec((R, K), lambda i: (0, 0)),
                pl.BlockSpec((K, O), lambda i: (0, 0)),
                pl.BlockSpec((1, O), lambda i: (0, 0)),
            ],
            out_specs=pl.BlockSpec((R, O), lambda i: (0, 0)),
        ),
        compiler_params=pltpu.CompilerParams(dimension_semantics=("arbitrary",)),
    )(x2, w, b.reshape(1, O))


# ----------------------------------------------------------------------------
# PeriodicityModule: tiny gather + cos + weighted sum; intentionally plain JAX
# (a standalone Pallas kernel here would only add an HBM round trip).
# ----------------------------------------------------------------------------
def periodicity_module(ts, ids, mask, all_a, all_p, all_f, all_mean):
    f = all_f[ids]                                   # (B, K)
    p = all_p[ids]                                   # (B, K)
    a = all_a[ids]                                   # (B, K)
    mean = all_mean[ids]                             # (B,)
    x = 2.0 * jnp.pi * ts[:, :, None] * f[:, None, :] + p[:, None, :]   # (B, T, K)
    x = jnp.cos(x)
    if mask is not None:
        # exact replication of inputKmask.unsqueeze(1).repeat(1, K, 1) semantics
        x = x * jnp.repeat(mask[:, None, :], x.shape[2], axis=1)
    return jnp.sum(x * a[:, None, :], axis=-1) + mean[:, None]          # (B, T)


def _fold_weight_norm(v, g):
    # weight_norm (dim=0): per-output-channel norm over (tap, in-channel) dims.
    norm = jnp.sqrt(jnp.sum(v * v, axis=(0, 2)))     # (C_out,)
    return v * (g / norm)[None, :, None]


# ----------------------------------------------------------------------------
# Full GTCN forward (Pallas path).
# ----------------------------------------------------------------------------
def gtcn_forward(params, inputs, Lk, timestamps, ids, mask, *, kernel_size):
    p_f = periodicity_module(timestamps, ids, mask, params["all_a"],
                             params["all_p"], params["all_f"], params["all_mean"])
    # PyTorch permutes inputs (B, N, T, F) -> NCHW (B, F, N, T).  The TCN stack
    # runs in node-major layout (B, N, C, T): every Pallas block is a full
    # lane-dense (C, T) slab with no size-1 sublane blocks.
    y = jnp.transpose(inputs, (0, 1, 3, 2))          # (B, N, F, T)
    y = tcn_stack(y, params["levels"], ks=kernel_size)         # (B, N, C, T)
    y_nchw = jnp.transpose(y, (0, 2, 1, 3))          # (B, C, N, T)
    # Spatio graph conv with p_f scaling fused into the same kernel.
    y3_node = spatio_conv_pf(y_nchw, y, Lk, params["theta"], params["b_s"], p_f)
    y3 = jnp.transpose(y3_node, (0, 2, 1, 3))        # (B, C, N, T), == p_f*y2
    B, C, N, T = y3.shape
    # Raw reshape (B,C,N,T) -> (B*N, C*T), exactly as PyTorch's .reshape.
    out = linear_pallas(y3.reshape(B * N, C * T), params["w_lin"], params["b_lin"])
    return out.reshape(B, N, -1)


# ----------------------------------------------------------------------------
# Pure-JAX reference (independent math path: XLA conv + einsums).
# ----------------------------------------------------------------------------
_HI = jax.lax.Precision.HIGHEST


def _causal_conv_ref(x, w, b, ks, d):
    P = (ks - 1) * d
    wt = jnp.transpose(w, (1, 2, 0))[:, :, None, :]  # (C_out, C_in, 1, ks)
    y = jax.lax.conv_general_dilated(
        x, wt, window_strides=(1, 1), padding=((0, 0), (P, P)),
        rhs_dilation=(1, d), dimension_numbers=("NCHW", "OIHW", "NCHW"),
        precision=_HI)
    y = y[:, :, :, : x.shape[-1]]                    # Chomp2d
    return jnp.tanh(y + b[None, :, None, None])


def _gauss_black_ref(x, lp, ks, d):
    h1 = _causal_conv_ref(x, lp["w1"], lp["b1"], ks, d)
    h2 = _causal_conv_ref(h1, lp["w2"], lp["b2"], ks, d)
    res = jnp.einsum("oc,bchw->bohw", lp["wd"], x, precision=_HI)
    res = res + lp["bd"][None, :, None, None]
    return jnp.maximum(h2 + res, 0.0)


def _spatio_ref(x, Lk, theta, b_s):
    xc = jnp.einsum("knm,bimt->binkt", Lk, x, precision=_HI)
    xg = jnp.einsum("iok,binkt->bont", theta, xc, precision=_HI)
    xg = xg + b_s[None, :, None, None]
    return jnp.maximum(xg + x, 0.0)


def gtcn_ref(params, inputs, Lk, timestamps, ids, mask, *, kernel_size):
    p_f = periodicity_module(timestamps, ids, mask, params["all_a"],
                             params["all_p"], params["all_f"], params["all_mean"])
    x = jnp.transpose(inputs, (0, 3, 1, 2))          # (B, F, N, T)
    y = x
    for lvl, lp in enumerate(params["levels"]):
        y = _gauss_black_ref(y, lp, kernel_size, 2 ** lvl)
    y2 = _spatio_ref(y, Lk, params["theta"], params["b_s"])
    y3 = p_f[:, None, :] * y2                        # PyTorch broadcast semantics
    B, C, N, T = y2.shape
    y3 = y3.reshape(B, N, C * T)
    return jnp.dot(y3, params["w_lin"], precision=_HI) + params["b_lin"]


if __name__ == "__main__":
    key = jax.random.PRNGKey(0)
    # Small shapes consistent with the module.  num_channels[-1] == batch so the
    # module's (B,1,T)x(B,C,N,T) p_f broadcast is valid (as in the PyTorch code).
    B, N_nodes, T, F_in = 4, 8, 32, 3
    num_channels = (8, 4)
    ks, Ks, K_fft, n_series, out_size = 3, 2, 5, 10, 6

    keys = jax.random.split(key, 40)
    kit = iter(keys)

    def nrm(shape, scale=0.1):
        return scale * jax.random.normal(next(kit), shape, dtype=jnp.float32)

    inputs = jax.random.normal(next(kit), (B, N_nodes, T, F_in), dtype=jnp.float32)
    Lk = 0.3 * jax.random.normal(next(kit), (Ks, N_nodes, N_nodes), dtype=jnp.float32)
    timestamps = jax.random.uniform(next(kit), (B, T), dtype=jnp.float32)
    ids = jax.random.randint(next(kit), (B,), 0, n_series)

    levels = []
    c_prev = F_in
    for c_out in num_channels:
        v1 = nrm((ks, c_out, c_prev))
        g1 = 1.0 + 0.1 * jax.random.normal(next(kit), (c_out,), dtype=jnp.float32)
        v2 = nrm((ks, c_out, c_out))
        g2 = 1.0 + 0.1 * jax.random.normal(next(kit), (c_out,), dtype=jnp.float32)
        levels.append(dict(
            w1=_fold_weight_norm(v1, g1), b1=nrm((c_out,)),
            w2=_fold_weight_norm(v2, g2), b2=nrm((c_out,)),
            wd=nrm((c_out, c_prev)), bd=nrm((c_out,)),
        ))
        c_prev = c_out
    # NOTE: the GaussBlack g_kernel_data buffer is never used in the PyTorch
    # forward, so it is not carried here.

    params = dict(
        levels=levels,
        theta=nrm((c_prev, c_prev, Ks), 0.3),
        b_s=nrm((c_prev,)),
        w_lin=nrm((c_prev * T, out_size), 0.05),
        b_lin=nrm((out_size,)),
        all_a=jax.random.normal(next(kit), (n_series, K_fft), dtype=jnp.float32),
        all_p=jax.random.normal(next(kit), (n_series, K_fft), dtype=jnp.float32),
        all_f=jax.random.normal(next(kit), (n_series, K_fft), dtype=jnp.float32),
        all_mean=jax.random.normal(next(kit), (n_series,), dtype=jnp.float32),
    )

    fwd = jax.jit(functools.partial(gtcn_forward, kernel_size=ks))
    out = fwd(params, inputs, Lk, timestamps, ids, None)
    out = jax.block_until_ready(out)

    ref = gtcn_ref(params, inputs, Lk, timestamps, ids, None, kernel_size=ks)
    ref = jax.block_until_ready(ref)

    assert out.shape == (B, N_nodes, out_size), out.shape
    max_err = float(jnp.max(jnp.abs(out - ref)))
    assert jnp.allclose(out, ref, rtol=2e-2, atol=1e-3), max_err

    print("KERNEL_OK")
</pallas_src>

<mosaic_0001>
module attributes {stable_mosaic.version = 11 : i64} {
  func.func @_spatio_pf_kernel(%arg0: i32, %arg1: i32, %arg2: memref<1x4x8x32xf32, #tpu.memory_space<vmem>>, %arg3: memref<1x1x4x32xf32, #tpu.memory_space<vmem>>, %arg4: memref<1x2x8xf32, #tpu.memory_space<vmem>>, %arg5: memref<4x4x2xf32, #tpu.memory_space<vmem>>, %arg6: memref<4x1xf32, #tpu.memory_space<vmem>>, %arg7: memref<4x32xf32, #tpu.memory_space<vmem>>, %arg8: memref<1x1x4x32xf32, #tpu.memory_space<vmem>>) attributes {dimension_semantics = [#tpu.dimension_semantics<parallel>, #tpu.dimension_semantics<parallel>], iteration_bounds = array<i64: 4, 8>, scalar_prefetch = 0 : i64, scratch_operands = 0 : i64, tpu.core_type = #tpu.core_type<tc>, window_params = [{transform_indices = @transform_0, window_bounds = array<i64: 1, 4, 8, 32>}, {transform_indices = @transform_1, window_bounds = array<i64: 1, 1, 4, 32>}, {transform_indices = @transform_2, window_bounds = array<i64: 1, 2, 8>}, {pipeline_mode = #tpu.pipeline_mode<synchronous>, transform_indices = @transform_3, window_bounds = array<i64: 4, 4, 2>}, {pipeline_mode = #tpu.pipeline_mode<synchronous>, transform_indices = @transform_4, window_bounds = array<i64: 4, 1>}, {pipeline_mode = #tpu.pipeline_mode<synchronous>, transform_indices = @transform_5, window_bounds = array<i64: 4, 32>}, {transform_indices = @transform_6, window_bounds = array<i64: 1, 1, 4, 32>}]} {
    %c0 = arith.constant 0 : index
    %c0_0 = arith.constant 0 : index
    %c0_1 = arith.constant 0 : index
    %0 = vector.load %arg4[%c0, %c0_0, %c0_1] : memref<1x2x8xf32, #tpu.memory_space<vmem>>, vector<1x2x8xf32>
    %1 = vector.shape_cast %0 : vector<1x2x8xf32> to vector<2x8xf32>
    %cst = arith.constant 0.000000e+00 : f32
    %2 = vector.broadcast %cst : f32 to vector<4x32xf32>
    %c0_2 = arith.constant 0 : index
    %c0_3 = arith.constant 0 : index
    %c0_4 = arith.constant 0 : index
    %c0_5 = arith.constant 0 : index
    %3 = vector.load %arg2[%c0_2, %c0_3, %c0_4, %c0_5] : memref<1x4x8x32xf32, #tpu.memory_space<vmem>>, vector<1x1x8x32xf32>
    %4 = vector.shape_cast %3 : vector<1x1x8x32xf32> to vector<8x32xf32>
    %cst_6 = arith.constant dense<0.000000e+00> : vector<2x32xf32>
    %5 = tpu.matmul %1, %4, %cst_6 {dimension_numbers = #tpu.dot_dimension_numbers<[1], [0], [0], [1], [0, 0, 1, 1], [], []>} : vector<2x8xf32>, vector<8x32xf32>, vector<2x32xf32> -> vector<2x32xf32>
    %c0_7 = arith.constant 0 : index
    %c0_8 = arith.constant 0 : index
    %c0_9 = arith.constant 0 : index
    %6 = vector.load %arg5[%c0_7, %c0_8, %c0_9] : memref<4x4x2xf32, #tpu.memory_space<vmem>>, vector<1x4x2xf32>
    %7 = vector.shape_cast %6 : vector<1x4x2xf32> to vector<4x2xf32>
    %cst_10 = arith.constant dense<0.000000e+00> : vector<4x32xf32>
    %8 = tpu.matmul %7, %5, %cst_10 {dimension_numbers = #tpu.dot_dimension_numbers<[1], [0], [0], [1], [0, 0, 1, 1], [], []>} : vector<4x2xf32>, vector<2x32xf32>, vector<4x32xf32> -> vector<4x32xf32>
    %9 = arith.addf %2, %8 : vector<4x32xf32>
    %c0_11 = arith.constant 0 : index
    %c1 = arith.constant 1 : index
    %c0_12 = arith.constant 0 : index
    %c0_13 = arith.constant 0 : index
    %10 = vector.load %arg2[%c0_11, %c1, %c0_12, %c0_13] : memref<1x4x8x32xf32, #tpu.memory_space<vmem>>, vector<1x1x8x32xf32>
    %11 = vector.shape_cast %10 : vector<1x1x8x32xf32> to vector<8x32xf32>
    %cst_14 = arith.constant dense<0.000000e+00> : vector<2x32xf32>
    %12 = tpu.matmul %1, %11, %cst_14 {dimension_numbers = #tpu.dot_dimension_numbers<[1], [0], [0], [1], [0, 0, 1, 1], [], []>} : vector<2x8xf32>, vector<8x32xf32>, vector<2x32xf32> -> vector<2x32xf32>
    %c1_15 = arith.constant 1 : index
    %c0_16 = arith.constant 0 : index
    %c0_17 = arith.constant 0 : index
    %13 = vector.load %arg5[%c1_15, %c0_16, %c0_17] : memref<4x4x2xf32, #tpu.memory_space<vmem>>, vector<1x4x2xf32>
    %14 = vector.shape_cast %13 : vector<1x4x2xf32> to vector<4x2xf32>
    %cst_18 = arith.constant dense<0.000000e+00> : vector<4x32xf32>
    %15 = tpu.matmul %14, %12, %cst_18 {dimension_numbers = #tpu.dot_dimension_numbers<[1], [0], [0], [1], [0, 0, 1, 1], [], []>} : vector<4x2xf32>, vector<2x32xf32>, vector<4x32xf32> -> vector<4x32xf32>
    %16 = arith.addf %9, %15 : vector<4x32xf32>
    %c0_19 = arith.constant 0 : index
    %c2 = arith.constant 2 : index
    %c0_20 = arith.constant 0 : index
    %c0_21 = arith.constant 0 : index
    %17 = vector.load %arg2[%c0_19, %c2, %c0_20, %c0_21] : memref<1x4x8x32xf32, #tpu.memory_space<vmem>>, vector<1x1x8x32xf32>
    %18 = vector.shape_cast %17 : vector<1x1x8x32xf32> to vector<8x32xf32>
    %cst_22 = arith.constant dense<0.000000e+00> : vector<2x32xf32>
    %19 = tpu.matmul %1, %18, %cst_22 {dimension_numbers = #tpu.dot_dimension_numbers<[1], [0], [0], [1], [0, 0, 1, 1], [], []>} : vector<2x8xf32>, vector<8x32xf32>, vector<2x32xf32> -> vector<2x32xf32>
    %c2_23 = arith.constant 2 : index
    %c0_24 = arith.constant 0 : index
    %c0_25 = arith.constant 0 : index
    %20 = vector.load %arg5[%c2_23, %c0_24, %c0_25] : memref<4x4x2xf32, #tpu.memory_space<vmem>>, vector<1x4x2xf32>
    %21 = vector.shape_cast %20 : vector<1x4x2xf32> to vector<4x2xf32>
    %cst_26 = arith.constant dense<0.000000e+00> : vector<4x32xf32>
    %22 = tpu.matmul %21, %19, %cst_26 {dimension_numbers = #tpu.dot_dimension_numbers<[1], [0], [0], [1], [0, 0, 1, 1], [], []>} : vector<4x2xf32>, vector<2x32xf32>, vector<4x32xf32> -> vector<4x32xf32>
    %23 = arith.addf %16, %22 : vector<4x32xf32>
    %c0_27 = arith.constant 0 : index
    %c3 = arith.constant 3 : index
    %c0_28 = arith.constant 0 : index
    %c0_29 = arith.constant 0 : index
    %24 = vector.load %arg2[%c0_27, %c3, %c0_28, %c0_29] : memref<1x4x8x32xf32, #tpu.memory_space<vmem>>, vector<1x1x8x32xf32>
    %25 = vector.shape_cast %24 : vector<1x1x8x32xf32> to vector<8x32xf32>
    %cst_30 = arith.constant dense<0.000000e+00> : vector<2x32xf32>
    %26 = tpu.matmul %1, %25, %cst_30 {dimension_numbers = #tpu.dot_dimension_numbers<[1], [0], [0], [1], [0, 0, 1, 1], [], []>} : vector<2x8xf32>, vector<8x32xf32>, vector<2x32xf32> -> vector<2x32xf32>
    %c3_31 = arith.constant 3 : index
    %c0_32 = arith.constant 0 : index
    %c0_33 = arith.constant 0 : index
    %27 = vector.load %arg5[%c3_31, %c0_32, %c0_33] : memref<4x4x2xf32, #tpu.memory_space<vmem>>, vector<1x4x2xf32>
    %28 = vector.shape_cast %27 : vector<1x4x2xf32> to vector<4x2xf32>
    %cst_34 = arith.constant dense<0.000000e+00> : vector<4x32xf32>
    %29 = tpu.matmul %28, %26, %cst_34 {dimension_numbers = #tpu.dot_dimension_numbers<[1], [0], [0], [1], [0, 0, 1, 1], [], []>} : vector<4x2xf32>, vector<2x32xf32>, vector<4x32xf32> -> vector<4x32xf32>
    %30 = arith.addf %23, %29 : vector<4x32xf32>
    %c0_35 = arith.constant 0 : index
    %c0_36 = arith.constant 0 : index
    %31 = vector.load %arg6[%c0_35, %c0_36] : memref<4x1xf32, #tpu.memory_space<vmem>>, vector<4x1xf32>
    %32 = vector.broadcast %31 : vector<4x1xf32> to vector<4x32xf32>
    %33 = arith.addf %30, %32 : vector<4x32xf32>
    %c0_37 = arith.constant 0 : index
    %c0_38 = arith.constant 0 : index
    %c0_39 = arith.constant 0 : index
    %c0_40 = arith.constant 0 : index
    %34 = vector.load %arg3[%c0_37, %c0_38, %c0_39, %c0_40] : memref<1x1x4x32xf32, #tpu.memory_space<vmem>>, vector<1x1x4x32xf32>
    %35 = vector.shape_cast %34 : vector<1x1x4x32xf32> to vector<4x32xf32>
    %36 = arith.addf %33, %35 : vector<4x32xf32>
    %c0_41 = arith.constant 0 : index
    %c0_42 = arith.constant 0 : index
    %37 = vector.load %arg7[%c0_41, %c0_42] : memref<4x32xf32, #tpu.memory_space<vmem>>, vector<4x32xf32>
    %cst_43 = arith.constant 0.000000e+00 : f32
    %38 = vector.broadcast %cst_43 : f32 to vector<4x32xf32>
    %39 = arith.maximumf %36, %38 : vector<4x32xf32>
    %40 = arith.mulf %37, %39 : vector<4x32xf32>
    %c0_44 = arith.constant 0 : index
    %c0_45 = arith.constant 0 : index
    %c0_46 = arith.constant 0 : index
    %c0_47 = arith.constant 0 : index
    %41 = vector.load %arg8[%c0_44, %c0_45, %c0_46, %c0_47] : memref<1x1x4x32xf32, #tpu.memory_space<vmem>>, vector<1x1x4x32xf32>
    %42 = vector.shape_cast %41 : vector<1x1x4x32xf32> to vector<4x32xf32>
    %43 = vector.shape_cast %40 : vector<4x32xf32> to vector<1x1x4x32xf32>
    tpu.vector_store %arg8[%c0_44, %c0_45, %c0_46, %c0_47], %43 {strides = array<i32>} : memref<1x1x4x32xf32, #tpu.memory_space<vmem>>, vector<1x1x4x32xf32>,
    return
  }
  func.func @transform_0(%arg0: i32, %arg1: i32) -> (i32, i32, i32, i32) {
    %c0_i32 = arith.constant 0 : i32
    %c0_i32_0 = arith.constant 0 : i32
    %c0_i32_1 = arith.constant 0 : i32
    %c0_i32_2 = arith.constant 0 : i32
    return %arg0, %c0_i32, %c0_i32_0, %c0_i32_1 : i32, i32, i32, i32
  }
  func.func @transform_1(%arg0: i32, %arg1: i32) -> (i32, i32, i32, i32) {
    %c0_i32 = arith.constant 0 : i32
    %c0_i32_0 = arith.constant 0 : i32
    %c0_i32_1 = arith.constant 0 : i32
    return %arg0, %arg1, %c0_i32, %c0_i32_0 : i32, i32, i32, i32
  }
  func.func @transform_2(%arg0: i32, %arg1: i32) -> (i32, i32, i32) {
    %c0_i32 = arith.constant 0 : i32
    %c0_i32_0 = arith.constant 0 : i32
    %c0_i32_1 = arith.constant 0 : i32
    return %arg1, %c0_i32, %c0_i32_0 : i32, i32, i32
  }
  func.func @transform_3(%arg0: i32, %arg1: i32) -> (i32, i32, i32) {
    %c0_i32 = arith.constant 0 : i32
    %c0_i32_0 = arith.constant 0 : i32
    %c0_i32_1 = arith.constant 0 : i32
    %c0_i32_2 = arith.constant 0 : i32
    return %c0_i32, %c0_i32_0, %c0_i32_1 : i32, i32, i32
  }
  func.func @transform_4(%arg0: i32, %arg1: i32) -> (i32, i32) {
    %c0_i32 = arith.constant 0 : i32
    %c0_i32_0 = arith.constant 0 : i32
    %c0_i32_1 = arith.constant 0 : i32
    return %c0_i32, %c0_i32_0 : i32, i32
  }
  func.func @transform_5(%arg0: i32, %arg1: i32) -> (i32, i32) {
    %c0_i32 = arith.constant 0 : i32
    %c0_i32_0 = arith.constant 0 : i32
    %c0_i32_1 = arith.constant 0 : i32
    return %c0_i32, %c0_i32_0 : i32, i32
  }
  func.func @transform_6(%arg0: i32, %arg1: i32) -> (i32, i32, i32, i32) {
    %c0_i32 = arith.constant 0 : i32
    %c0_i32_0 = arith.constant 0 : i32
    %c0_i32_1 = arith.constant 0 : i32
    return %arg0, %arg1, %c0_i32, %c0_i32_0 : i32, i32, i32, i32
  }
}

module attributes {stable_mosaic.version = 11 : i64} {
  func.func @_tcn_stack_kernel(%arg0: i32, %arg1: i32, %arg2: memref<1x1x3x32xf32, #tpu.memory_space<vmem>>, %arg3: memref<3x8x3xf32, #tpu.memory_space<vmem>>, %arg4: memref<8x1xf32, #tpu.memory_space<vmem>>, %arg5: memref<3x8x8xf32, #tpu.memory_space<vmem>>, %arg6: memref<8x1xf32, #tpu.memory_space<vmem>>, %arg7: memref<8x3xf32, #tpu.memory_space<vmem>>, %arg8: memref<8x1xf32, #tpu.memory_space<vmem>>, %arg9: memref<3x4x8xf32, #tpu.memory_space<vmem>>, %arg10: memref<4x1xf32, #tpu.memory_space<vmem>>, %arg11: memref<3x4x4xf32, #tpu.memory_space<vmem>>, %arg12: memref<4x1xf32, #tpu.memory_space<vmem>>, %arg13: memref<4x8xf32, #tpu.memory_space<vmem>>, %arg14: memref<4x1xf32, #tpu.memory_space<vmem>>, %arg15: memref<1x1x4x32xf32, #tpu.memory_space<vmem>>, %arg16: memref<3x34xf32, #tpu.memory_space<vmem>>, %arg17: memref<8x34xf32, #tpu.memory_space<vmem>>, %arg18: memref<8x36xf32, #tpu.memory_space<vmem>>, %arg19: memref<4x36xf32, #tpu.memory_space<vmem>>) attributes {dimension_semantics = [#tpu.dimension_semantics<parallel>, #tpu.dimension_semantics<parallel>], iteration_bounds = array<i64: 4, 8>, scalar_prefetch = 0 : i64, scratch_operands = 4 : i64, tpu.core_type = #tpu.core_type<tc>, window_params = [{transform_indices = @transform_0, window_bounds = array<i64: 1, 1, 3, 32>}, {pipeline_mode = #tpu.pipeline_mode<synchronous>, transform_indices = @transform_1, window_bounds = array<i64: 3, 8, 3>}, {pipeline_mode = #tpu.pipeline_mode<synchronous>, transform_indices = @transform_2, window_bounds = array<i64: 8, 1>}, {pipeline_mode = #tpu.pipeline_mode<synchronous>, transform_indices = @transform_3, window_bounds = array<i64: 3, 8, 8>}, {pipeline_mode = #tpu.pipeline_mode<synchronous>, transform_indices = @transform_4, window_bounds = array<i64: 8, 1>}, {pipeline_mode = #tpu.pipeline_mode<synchronous>, transform_indices = @transform_5, window_bounds = array<i64: 8, 3>}, {pipeline_mode = #tpu.pipeline_mode<synchronous>, transform_indices = @transform_6, window_bounds = array<i64: 8, 1>}, {pipeline_mode = #tpu.pipeline_mode<synchronous>, transform_indices = @transform_7, window_bounds = array<i64: 3, 4, 8>}, {pipeline_mode = #tpu.pipeline_mode<synchronous>, transform_indices = @transform_8, window_bounds = array<i64: 4, 1>}, {pipeline_mode = #tpu.pipeline_mode<synchronous>, transform_indices = @transform_9, window_bounds = array<i64: 3, 4, 4>}, {pipeline_mode = #tpu.pipeline_mode<synchronous>, transform_indices = @transform_10, window_bounds = array<i64: 4, 1>}, {pipeline_mode = #tpu.pipeline_mode<synchronous>, transform_indices = @transform_11, window_bounds = array<i64: 4, 8>}, {pipeline_mode = #tpu.pipeline_mode<synchronous>, transform_indices = @transform_12, window_bounds = array<i64: 4, 1>}, {transform_indices = @transform_13, window_bounds = array<i64: 1, 1, 4, 32>}]} {
    %c0 = arith.constant 0 : index
    %c0_0 = arith.constant 0 : index
    %c0_1 = arith.constant 0 : index
    %c0_2 = arith.constant 0 : index
    %0 = vector.load %arg2[%c0, %c0_0, %c0_1, %c0_2] : memref<1x1x3x32xf32, #tpu.memory_space<vmem>>, vector<1x1x3x32xf32>
    %1 = vector.shape_cast %0 : vector<1x1x3x32xf32> to vector<3x32xf32>
    %cst = arith.constant 0.000000e+00 : f32
    %2 = vector.broadcast %cst : f32 to vector<3x2xf32>
    %c0_3 = arith.constant 0 : index
    %c0_4 = arith.constant 0 : index
    %3 = vector.load %arg16[%c0_3, %c0_4] : memref<3x34xf32, #tpu.memory_space<vmem>>, vector<3x2xf32>
    tpu.vector_store %arg16[%c0_3, %c0_4], %2 {strides = array<i32>} : memref<3x34xf32, #tpu.memory_space<vmem>>, vector<3x2xf32>,
    %c0_5 = arith.constant 0 : index
    %c2 = arith.constant 2 : index
    %4 = vector.load %arg16[%c0_5, %c2] : memref<3x34xf32, #tpu.memory_space<vmem>>, vector<3x32xf32>
    tpu.vector_store %arg16[%c0_5, %c2], %1 {strides = array<i32>} : memref<3x34xf32, #tpu.memory_space<vmem>>, vector<3x32xf32>,
    %cst_6 = arith.constant 0.000000e+00 : f32
    %5 = vector.broadcast %cst_6 : f32 to vector<8x32xf32>
    %c0_7 = arith.constant 0 : index
    %c0_8 = arith.constant 0 : index
    %c0_9 = arith.constant 0 : index
    %6 = vector.load %arg3[%c0_7, %c0_8, %c0_9] : memref<3x8x3xf32, #tpu.memory_space<vmem>>, vector<1x8x3xf32>
    %7 = vector.shape_cast %6 : vector<1x8x3xf32> to vector<8x3xf32>
    %c0_10 = arith.constant 0 : index
    %c0_11 = arith.constant 0 : index
    %8 = vector.load %arg16[%c0_10, %c0_11] : memref<3x34xf32, #tpu.memory_space<vmem>>, vector<3x32xf32>
    %cst_12 = arith.constant dense<0.000000e+00> : vector<8x32xf32>
    %9 = tpu.matmul %7, %8, %cst_12 {dimension_numbers = #tpu.dot_dimension_numbers<[1], [0], [0], [1], [0, 0, 1, 1], [], []>} : vector<8x3xf32>, vector<3x32xf32>, vector<8x32xf32> -> vector<8x32xf32>
    %10 = arith.addf %5, %9 : vector<8x32xf32>
    %c1 = arith.constant 1 : index
    %c0_13 = arith.constant 0 : index
    %c0_14 = arith.constant 0 : index
    %11 = vector.load %arg3[%c1, %c0_13, %c0_14] : memref<3x8x3xf32, #tpu.memory_space<vmem>>, vector<1x8x3xf32>
    %12 = vector.shape_cast %11 : vector<1x8x3xf32> to vector<8x3xf32>
    %c0_15 = arith.constant 0 : index
    %c1_16 = arith.constant 1 : index
    %13 = vector.load %arg16[%c0_15, %c1_16] : memref<3x34xf32, #tpu.memory_space<vmem>>, vector<3x32xf32>
    %cst_17 = arith.constant dense<0.000000e+00> : vector<8x32xf32>
    %14 = tpu.matmul %12, %13, %cst_17 {dimension_numbers = #tpu.dot_dimension_numbers<[1], [0], [0], [1], [0, 0, 1, 1], [], []>} : vector<8x3xf32>, vector<3x32xf32>, vector<8x32xf32> -> vector<8x32xf32>
    %15 = arith.addf %10, %14 : vector<8x32xf32>
    %c2_18 = arith.constant 2 : index
    %c0_19 = arith.constant 0 : index
    %c0_20 = arith.constant 0 : index
    %16 = vector.load %arg3[%c2_18, %c0_19, %c0_20] : memref<3x8x3xf32, #tpu.memory_space<vmem>>, vector<1x8x3xf32>
    %17 = vector.shape_cast %16 : vector<1x8x3xf32> to vector<8x3xf32>
    %c0_21 = arith.constant 0 : index
    %c2_22 = arith.constant 2 : index
    %18 = vector.load %arg16[%c0_21, %c2_22] : memref<3x34xf32, #tpu.memory_space<vmem>>, vector<3x32xf32>
    %cst_23 = arith.constant dense<0.000000e+00> : vector<8x32xf32>
    %19 = tpu.matmul %17, %18, %cst_23 {dimension_numbers = #tpu.dot_dimension_numbers<[1], [0], [0], [1], [0, 0, 1, 1], [], []>} : vector<8x3xf32>, vector<3x32xf32>, vector<8x32xf32> -> vector<8x32xf32>
    %20 = arith.addf %15, %19 : vector<8x32xf32>
    %c0_24 = arith.constant 0 : index
    %c0_25 = arith.constant 0 : index
    %21 = vector.load %arg4[%c0_24, %c0_25] : memref<8x1xf32, #tpu.memory_space<vmem>>, vector<8x1xf32>
    %22 = vector.broadcast %21 : vector<8x1xf32> to vector<8x32xf32>
    %23 = arith.addf %20, %22 : vector<8x32xf32>
    %24 = math.tanh %23 : vector<8x32xf32>
    %cst_26 = arith.constant 0.000000e+00 : f32
    %25 = vector.broadcast %cst_26 : f32 to vector<8x2xf32>
    %c0_27 = arith.constant 0 : index
    %c0_28 = arith.constant 0 : index
    %26 = vector.load %arg17[%c0_27, %c0_28] : memref<8x34xf32, #tpu.memory_space<vmem>>, vector<8x2xf32>
    tpu.vector_store %arg17[%c0_27, %c0_28], %25 {strides = array<i32>} : memref<8x34xf32, #tpu.memory_space<vmem>>, vector<8x2xf32>,
    %c0_29 = arith.constant 0 : index
    %c2_30 = arith.constant 2 : index
    %27 = vector.load %arg17[%c0_29, %c2_30] : memref<8x34xf32, #tpu.memory_space<vmem>>, vector<8x32xf32>
    tpu.vector_store %arg17[%c0_29, %c2_30], %24 {strides = array<i32>} : memref<8x34xf32, #tpu.memory_space<vmem>>, vector<8x32xf32>,
    %cst_31 = arith.constant 0.000000e+00 : f32
    %28 = vector.broadcast %cst_31 : f32 to vector<8x32xf32>
    %c0_32 = arith.constant 0 : index
    %c0_33 = arith.constant 0 : index
    %c0_34 = arith.constant 0 : index
    %29 = vector.load %arg5[%c0_32, %c0_33, %c0_34] : memref<3x8x8xf32, #tpu.memory_space<vmem>>, vector<1x8x8xf32>
    %30 = vector.shape_cast %29 : vector<1x8x8xf32> to vector<8x8xf32>
    %c0_35 = arith.constant 0 : index
    %c0_36 = arith.constant 0 : index
    %31 = vector.load %arg17[%c0_35, %c0_36] : memref<8x34xf32, #tpu.memory_space<vmem>>, vector<8x32xf32>
    %cst_37 = arith.constant dense<0.000000e+00> : vector<8x32xf32>
    %32 = tpu.matmul %30, %31, %cst_37 {dimension_numbers = #tpu.dot_dimension_numbers<[1], [0], [0], [1], [0, 0, 1, 1], [], []>} : vector<8x8xf32>, vector<8x32xf32>, vector<8x32xf32> -> vector<8x32xf32>
    %33 = arith.addf %28, %32 : vector<8x32xf32>
    %c1_38 = arith.constant 1 : index
    %c0_39 = arith.constant 0 : index
    %c0_40 = arith.constant 0 : index
    %34 = vector.load %arg5[%c1_38, %c0_39, %c0_40] : memref<3x8x8xf32, #tpu.memory_space<vmem>>, vector<1x8x8xf32>
    %35 = vector.shape_cast %34 : vector<1x8x8xf32> to vector<8x8xf32>
    %c0_41 = arith.constant 0 : index
    %c1_42 = arith.constant 1 : index
    %36 = vector.load %arg17[%c0_41, %c1_42] : memref<8x34xf32, #tpu.memory_space<vmem>>, vector<8x32xf32>
    %cst_43 = arith.constant dense<0.000000e+00> : vector<8x32xf32>
    %37 = tpu.matmul %35, %36, %cst_43 {dimension_numbers = #tpu.dot_dimension_numbers<[1], [0], [0], [1], [0, 0, 1, 1], [], []>} : vector<8x8xf32>, vector<8x32xf32>, vector<8x32xf32> -> vector<8x32xf32>
    %38 = arith.addf %33, %37 : vector<8x32xf32>
    %c2_44 = arith.constant 2 : index
    %c0_45 = arith.constant 0 : index
    %c0_46 = arith.constant 0 : index
    %39 = vector.load %arg5[%c2_44, %c0_45, %c0_46] : memref<3x8x8xf32, #tpu.memory_space<vmem>>, vector<1x8x8xf32>
    %40 = vector.shape_cast %39 : vector<1x8x8xf32> to vector<8x8xf32>
    %c0_47 = arith.constant 0 : index
    %c2_48 = arith.constant 2 : index
    %41 = vector.load %arg17[%c0_47, %c2_48] : memref<8x34xf32, #tpu.memory_space<vmem>>, vector<8x32xf32>
    %cst_49 = arith.constant dense<0.000000e+00> : vector<8x32xf32>
    %42 = tpu.matmul %40, %41, %cst_49 {dimension_numbers = #tpu.dot_dimension_numbers<[1], [0], [0], [1], [0, 0, 1, 1], [], []>} : vector<8x8xf32>, vector<8x32xf32>, vector<8x32xf32> -> vector<8x32xf32>
    %43 = arith.addf %38, %42 : vector<8x32xf32>
    %c0_50 = arith.constant 0 : index
    %c0_51 = arith.constant 0 : index
    %44 = vector.load %arg6[%c0_50, %c0_51] : memref<8x1xf32, #tpu.memory_space<vmem>>, vector<8x1xf32>
    %45 = vector.broadcast %44 : vector<8x1xf32> to vector<8x32xf32>
    %46 = arith.addf %43, %45 : vector<8x32xf32>
    %47 = math.tanh %46 : vector<8x32xf32>
    %c0_52 = arith.constant 0 : index
    %c0_53 = arith.constant 0 : index
    %48 = vector.load %arg7[%c0_52, %c0_53] : memref<8x3xf32, #tpu.memory_space<vmem>>, vector<8x3xf32>
    %cst_54 = arith.constant dense<0.000000e+00> : vector<8x32xf32>
    %49 = tpu.matmul %48, %1, %cst_54 {dimension_numbers = #tpu.dot_dimension_numbers<[1], [0], [0], [1], [0, 0, 1, 1], [], []>} : vector<8x3xf32>, vector<3x32xf32>, vector<8x32xf32> -> vector<8x32xf32>
    %c0_55 = arith.constant 0 : index
    %c0_56 = arith.constant 0 : index
    %50 = vector.load %arg8[%c0_55, %c0_56] : memref<8x1xf32, #tpu.memory_space<vmem>>, vector<8x1xf32>
    %51 = vector.broadcast %50 : vector<8x1xf32> to vector<8x32xf32>
    %52 = arith.addf %49, %51 : vector<8x32xf32>
    %53 = arith.addf %47, %52 : vector<8x32xf32>
    %cst_57 = arith.constant 0.000000e+00 : f32
    %54 = vector.broadcast %cst_57 : f32 to vector<8x32xf32>
    %55 = arith.maximumf %53, %54 : vector<8x32xf32>
    %cst_58 = arith.constant 0.000000e+00 : f32
    %56 = vector.broadcast %cst_58 : f32 to vector<8x4xf32>
    %c0_59 = arith.constant 0 : index
    %c0_60 = arith.constant 0 : index
    %57 = vector.load %arg18[%c0_59, %c0_60] : memref<8x36xf32, #tpu.memory_space<vmem>>, vector<8x4xf32>
    tpu.vector_store %arg18[%c0_59, %c0_60], %56 {strides = array<i32>} : memref<8x36xf32, #tpu.memory_space<vmem>>, vector<8x4xf32>,
    %c0_61 = arith.constant 0 : index
    %c4 = arith.constant 4 : index
    %58 = vector.load %arg18[%c0_61, %c4] : memref<8x36xf32, #tpu.memory_space<vmem>>, vector<8x32xf32>
    tpu.vector_store %arg18[%c0_61, %c4], %55 {strides = array<i32>} : memref<8x36xf32, #tpu.memory_space<vmem>>, vector<8x32xf32>,
    %cst_62 = arith.constant 0.000000e+00 : f32
    %59 = vector.broadcast %cst_62 : f32 to vector<4x32xf32>
    %c0_63 = arith.constant 0 : index
    %c0_64 = arith.constant 0 : index
    %c0_65 = arith.constant 0 : index
    %60 = vector.load %arg9[%c0_63, %c0_64, %c0_65] : memref<3x4x8xf32, #tpu.memory_space<vmem>>, vector<1x4x8xf32>
    %61 = vector.shape_cast %60 : vector<1x4x8xf32> to vector<4x8xf32>
    %c0_66 = arith.constant 0 : index
    %c0_67 = arith.constant 0 : index
    %62 = vector.load %arg18[%c0_66, %c0_67] : memref<8x36xf32, #tpu.memory_space<vmem>>, vector<8x32xf32>
    %cst_68 = arith.constant dense<0.000000e+00> : vector<4x32xf32>
    %63 = tpu.matmul %61, %62, %cst_68 {dimension_numbers = #tpu.dot_dimension_numbers<[1], [0], [0], [1], [0, 0, 1, 1], [], []>} : vector<4x8xf32>, vector<8x32xf32>, vector<4x32xf32> -> vector<4x32xf32>
    %64 = arith.addf %59, %63 : vector<4x32xf32>
    %c1_69 = arith.constant 1 : index
    %c0_70 = arith.constant 0 : index
    %c0_71 = arith.constant 0 : index
    %65 = vector.load %arg9[%c1_69, %c0_70, %c0_71] : memref<3x4x8xf32, #tpu.memory_space<vmem>>, vector<1x4x8xf32>
    %66 = vector.shape_cast %65 : vector<1x4x8xf32> to vector<4x8xf32>
    %c0_72 = arith.constant 0 : index
    %c2_73 = arith.constant 2 : index
    %67 = vector.load %arg18[%c0_72, %c2_73] : memref<8x36xf32, #tpu.memory_space<vmem>>, vector<8x32xf32>
    %cst_74 = arith.constant dense<0.000000e+00> : vector<4x32xf32>
    %68 = tpu.matmul %66, %67, %cst_74 {dimension_numbers = #tpu.dot_dimension_numbers<[1], [0], [0], [1], [0, 0, 1, 1], [], []>} : vector<4x8xf32>, vector<8x32xf32>, vector<4x32xf32> -> vector<4x32xf32>
    %69 = arith.addf %64, %68 : vector<4x32xf32>
    %c2_75 = arith.constant 2 : index
    %c0_76 = arith.constant 0 : index
    %c0_77 = arith.constant 0 : index
    %70 = vector.load %arg9[%c2_75, %c0_76, %c0_77] : memref<3x4x8xf32, #tpu.memory_space<vmem>>, vector<1x4x8xf32>
    %71 = vector.shape_cast %70 : vector<1x4x8xf32> to vector<4x8xf32>
    %c0_78 = arith.constant 0 : index
    %c4_79 = arith.constant 4 : index
    %72 = vector.load %arg18[%c0_78, %c4_79] : memref<8x36xf32, #tpu.memory_space<vmem>>, vector<8x32xf32>
    %cst_80 = arith.constant dense<0.000000e+00> : vector<4x32xf32>
    %73 = tpu.matmul %71, %72, %cst_80 {dimension_numbers = #tpu.dot_dimension_numbers<[1], [0], [0], [1], [0, 0, 1, 1], [], []>} : vector<4x8xf32>, vector<8x32xf32>, vector<4x32xf32> -> vector<4x32xf32>
    %74 = arith.addf %69, %73 : vector<4x32xf32>
    %c0_81 = arith.constant 0 : index
    %c0_82 = arith.constant 0 : index
    %75 = vector.load %arg10[%c0_81, %c0_82] : memref<4x1xf32, #tpu.memory_space<vmem>>, vector<4x1xf32>
    %76 = vector.broadcast %75 : vector<4x1xf32> to vector<4x32xf32>
    %77 = arith.addf %74, %76 : vector<4x32xf32>
    %78 = math.tanh %77 : vector<4x32xf32>
    %cst_83 = arith.constant 0.000000e+00 : f32
    %79 = vector.broadcast %cst_83 : f32 to vector<4x4xf32>
    %c0_84 = arith.constant 0 : index
    %c0_85 = arith.constant 0 : index
    %80 = vector.load %arg19[%c0_84, %c0_85] : memref<4x36xf32, #tpu.memory_space<vmem>>, vector<4x4xf32>
    tpu.vector_store %arg19[%c0_84, %c0_85], %79 {strides = array<i32>} : memref<4x36xf32, #tpu.memory_space<vmem>>, vector<4x4xf32>,
    %c0_86 = arith.constant 0 : index
    %c4_87 = arith.constant 4 : index
    %81 = vector.load %arg19[%c0_86, %c4_87] : memref<4x36xf32, #tpu.memory_space<vmem>>, vector<4x32xf32>
    tpu.vector_store %arg19[%c0_86, %c4_87], %78 {strides = array<i32>} : memref<4x36xf32, #tpu.memory_space<vmem>>, vector<4x32xf32>,
    %cst_88 = arith.constant 0.000000e+00 : f32
    %82 = vector.broadcast %cst_88 : f32 to vector<4x32xf32>
    %c0_89 = arith.constant 0 : index
    %c0_90 = arith.constant 0 : index
    %c0_91 = arith.constant 0 : index
    %83 = vector.load %arg11[%c0_89, %c0_90, %c0_91] : memref<3x4x4xf32, #tpu.memory_space<vmem>>, vector<1x4x4xf32>
    %84 = vector.shape_cast %83 : vector<1x4x4xf32> to vector<4x4xf32>
    %c0_92 = arith.constant 0 : index
    %c0_93 = arith.constant 0 : index
    %85 = vector.load %arg19[%c0_92, %c0_93] : memref<4x36xf32, #tpu.memory_space<vmem>>, vector<4x32xf32>
    %cst_94 = arith.constant dense<0.000000e+00> : vector<4x32xf32>
    %86 = tpu.matmul %84, %85, %cst_94 {dimension_numbers = #tpu.dot_dimension_numbers<[1], [0], [0], [1], [0, 0, 1, 1], [], []>} : vector<4x4xf32>, vector<4x32xf32>, vector<4x32xf32> -> vector<4x32xf32>
    %87 = arith.addf %82, %86 : vector<4x32xf32>
    %c1_95 = arith.constant 1 : index
    %c0_96 = arith.constant 0 : index
    %c0_97 = arith.constant 0 : index
    %88 = vector.load %arg11[%c1_95, %c0_96, %c0_97] : memref<3x4x4xf32, #tpu.memory_space<vmem>>, vector<1x4x4xf32>
    %89 = vector.shape_cast %88 : vector<1x4x4xf32> to vector<4x4xf32>
    %c0_98 = arith.constant 0 : index
    %c2_99 = arith.constant 2 : index
    %90 = vector.load %arg19[%c0_98, %c2_99] : memref<4x36xf32, #tpu.memory_space<vmem>>, vector<4x32xf32>
    %cst_100 = arith.constant dense<0.000000e+00> : vector<4x32xf32>
    %91 = tpu.matmul %89, %90, %cst_100 {dimension_numbers = #tpu.dot_dimension_numbers<[1], [0], [0], [1], [0, 0, 1, 1], [], []>} : vector<4x4xf32>, vector<4x32xf32>, vector<4x32xf32> -> vector<4x32xf32>
    %92 = arith.addf %87, %91 : vector<4x32xf32>
    %c2_101 = arith.constant 2 : index
    %c0_102 = arith.constant 0 : index
    %c0_103 = arith.constant 0 : index
    %93 = vector.load %arg11[%c2_101, %c0_102, %c0_103] : memref<3x4x4xf32, #tpu.memory_space<vmem>>, vector<1x4x4xf32>
    %94 = vector.shape_cast %93 : vector<1x4x4xf32> to vector<4x4xf32>
    %c0_104 = arith.constant 0 : index
    %c4_105 = arith.constant 4 : index
    %95 = vector.load %arg19[%c0_104, %c4_105] : memref<4x36xf32, #tpu.memory_space<vmem>>, vector<4x32xf32>
    %cst_106 = arith.constant dense<0.000000e+00> : vector<4x32xf32>
    %96 = tpu.matmul %94, %95, %cst_106 {dimension_numbers = #tpu.dot_dimension_numbers<[1], [0], [0], [1], [0, 0, 1, 1], [], []>} : vector<4x4xf32>, vector<4x32xf32>, vector<4x32xf32> -> vector<4x32xf32>
    %97 = arith.addf %92, %96 : vector<4x32xf32>
    %c0_107 = arith.constant 0 : index
    %c0_108 = arith.constant 0 : index
    %98 = vector.load %arg12[%c0_107, %c0_108] : memref<4x1xf32, #tpu.memory_space<vmem>>, vector<4x1xf32>
    %99 = vector.broadcast %98 : vector<4x1xf32> to vector<4x32xf32>
    %100 = arith.addf %97, %99 : vector<4x32xf32>
    %101 = math.tanh %100 : vector<4x32xf32>
    %c0_109 = arith.constant 0 : index
    %c0_110 = arith.constant 0 : index
    %102 = vector.load %arg13[%c0_109, %c0_110] : memref<4x8xf32, #tpu.memory_space<vmem>>, vector<4x8xf32>
    %cst_111 = arith.constant dense<0.000000e+00> : vector<4x32xf32>
    %103 = tpu.matmul %102, %55, %cst_111 {dimension_numbers = #tpu.dot_dimension_numbers<[1], [0], [0], [1], [0, 0, 1, 1], [], []>} : vector<4x8xf32>, vector<8x32xf32>, vector<4x32xf32> -> vector<4x32xf32>
    %c0_112 = arith.constant 0 : index
    %c0_113 = arith.constant 0 : index
    %104 = vector.load %arg14[%c0_112, %c0_113] : memref<4x1xf32, #tpu.memory_space<vmem>>, vector<4x1xf32>
    %105 = vector.broadcast %104 : vector<4x1xf32> to vector<4x32xf32>
    %106 = arith.addf %103, %105 : vector<4x32xf32>
    %107 = arith.addf %101, %106 : vector<4x32xf32>
    %cst_114 = arith.constant 0.000000e+00 : f32
    %108 = vector.broadcast %cst_114 : f32 to vector<4x32xf32>
    %109 = arith.maximumf %107, %108 : vector<4x32xf32>
    %c0_115 = arith.constant 0 : index
    %c0_116 = arith.constant 0 : index
    %c0_117 = arith.constant 0 : index
    %c0_118 = arith.constant 0 : index
    %110 = vector.load %arg15[%c0_115, %c0_116, %c0_117, %c0_118] : memref<1x1x4x32xf32, #tpu.memory_space<vmem>>, vector<1x1x4x32xf32>
    %111 = vector.shape_cast %110 : vector<1x1x4x32xf32> to vector<4x32xf32>
    %112 = vector.shape_cast %109 : vector<4x32xf32> to vector<1x1x4x32xf32>
    tpu.vector_store %arg15[%c0_115, %c0_116, %c0_117, %c0_118], %112 {strides = array<i32>} : memref<1x1x4x32xf32, #tpu.memory_space<vmem>>, vector<1x1x4x32xf32>,
    return
  }
  func.func @transform_0(%arg0: i32, %arg1: i32) -> (i32, i32, i32, i32) {
    %c0_i32 = arith.constant 0 : i32
    %c0_i32_0 = arith.constant 0 : i32
    %c0_i32_1 = arith.constant 0 : i32
    return %arg0, %arg1, %c0_i32, %c0_i32_0 : i32, i32, i32, i32
  }
  func.func @transform_1(%arg0: i32, %arg1: i32) -> (i32, i32, i32) {
    %c0_i32 = arith.constant 0 : i32
    %c0_i32_0 = arith.constant 0 : i32
    %c0_i32_1 = arith.constant 0 : i32
    %c0_i32_2 = arith.constant 0 : i32
    return %c0_i32, %c0_i32_0, %c0_i32_1 : i32, i32, i32
  }
  func.func @transform_2(%arg0: i32, %arg1: i32) -> (i32, i32) {
    %c0_i32 = arith.constant 0 : i32
    %c0_i32_0 = arith.constant 0 : i32
    %c0_i32_1 = arith.constant 0 : i32
    return %c0_i32, %c0_i32_0 : i32, i32
  }
  func.func @transform_3(%arg0: i32, %arg1: i32) -> (i32, i32, i32) {
    %c0_i32 = arith.constant 0 : i32
    %c0_i32_0 = arith.constant 0 : i32
    %c0_i32_1 = arith.constant 0 : i32
    %c0_i32_2 = arith.constant 0 : i32
    return %c0_i32, %c0_i32_0, %c0_i32_1 : i32, i32, i32
  }
  func.func @transform_4(%arg0: i32, %arg1: i32) -> (i32, i32) {
    %c0_i32 = arith.constant 0 : i32
    %c0_i32_0 = arith.constant 0 : i32
    %c0_i32_1 = arith.constant 0 : i32
    return %c0_i32, %c0_i32_0 : i32, i32
  }
  func.func @transform_5(%arg0: i32, %arg1: i32) -> (i32, i32) {
    %c0_i32 = arith.constant 0 : i32
    %c0_i32_0 = arith.constant 0 : i32
    %c0_i32_1 = arith.constant 0 : i32
    return %c0_i32, %c0_i32_0 : i32, i32
  }
  func.func @transform_6(%arg0: i32, %arg1: i32) -> (i32, i32) {
    %c0_i32 = arith.constant 0 : i32
    %c0_i32_0 = arith.constant 0 : i32
    %c0_i32_1 = arith.constant 0 : i32
    return %c0_i32, %c0_i32_0 : i32, i32
  }
  func.func @transform_7(%arg0: i32, %arg1: i32) -> (i32, i32, i32) {
    %c0_i32 = arith.constant 0 : i32
    %c0_i32_0 = arith.constant 0 : i32
    %c0_i32_1 = arith.constant 0 : i32
    %c0_i32_2 = arith.constant 0 : i32
    return %c0_i32, %c0_i32_0, %c0_i32_1 : i32, i32, i32
  }
  func.func @transform_8(%arg0: i32, %arg1: i32) -> (i32, i32) {
    %c0_i32 = arith.constant 0 : i32
    %c0_i32_0 = arith.constant 0 : i32
    %c0_i32_1 = arith.constant 0 : i32
    return %c0_i32, %c0_i32_0 : i32, i32
  }
  func.func @transform_9(%arg0: i32, %arg1: i32) -> (i32, i32, i32) {
    %c0_i32 = arith.constant 0 : i32
    %c0_i32_0 = arith.constant 0 : i32
    %c0_i32_1 = arith.constant 0 : i32
    %c0_i32_2 = arith.constant 0 : i32
    return %c0_i32, %c0_i32_0, %c0_i32_1 : i32, i32, i32
  }
  func.func @transform_10(%arg0: i32, %arg1: i32) -> (i32, i32) {
    %c0_i32 = arith.constant 0 : i32
    %c0_i32_0 = arith.constant 0 : i32
    %c0_i32_1 = arith.constant 0 : i32
    return %c0_i32, %c0_i32_0 : i32, i32
  }
  func.func @transform_11(%arg0: i32, %arg1: i32) -> (i32, i32) {
    %c0_i32 = arith.constant 0 : i32
    %c0_i32_0 = arith.constant 0 : i32
    %c0_i32_1 = arith.constant 0 : i32
    return %c0_i32, %c0_i32_0 : i32, i32
  }
  func.func @transform_12(%arg0: i32, %arg1: i32) -> (i32, i32) {
    %c0_i32 = arith.constant 0 : i32
    %c0_i32_0 = arith.constant 0 : i32
    %c0_i32_1 = arith.constant 0 : i32
    return %c0_i32, %c0_i32_0 : i32, i32
  }
  func.func @transform_13(%arg0: i32, %arg1: i32) -> (i32, i32, i32, i32) {
    %c0_i32 = arith.constant 0 : i32
    %c0_i32_0 = arith.constant 0 : i32
    %c0_i32_1 = arith.constant 0 : i32
    return %arg0, %arg1, %c0_i32, %c0_i32_0 : i32, i32, i32, i32
  }
}

module attributes {stable_mosaic.version = 11 : i64} {
  func.func @_linear_kernel(%arg0: i32, %arg1: memref<32x128xf32, #tpu.memory_space<vmem>>, %arg2: memref<128x6xf32, #tpu.memory_space<vmem>>, %arg3: memref<1x6xf32, #tpu.memory_space<vmem>>, %arg4: memref<32x6xf32, #tpu.memory_space<vmem>>) attributes {dimension_semantics = [#tpu.dimension_semantics<arbitrary>], iteration_bounds = array<i64: 1>, scalar_prefetch = 0 : i64, scratch_operands = 0 : i64, tpu.core_type = #tpu.core_type<tc>, window_params = [{pipeline_mode = #tpu.pipeline_mode<synchronous>, transform_indices = @transform_0, window_bounds = array<i64: 32, 128>}, {pipeline_mode = #tpu.pipeline_mode<synchronous>, transform_indices = @transform_1, window_bounds = array<i64: 128, 6>}, {pipeline_mode = #tpu.pipeline_mode<synchronous>, transform_indices = @transform_2, window_bounds = array<i64: 1, 6>}, {pipeline_mode = #tpu.pipeline_mode<synchronous>, transform_indices = @transform_3, window_bounds = array<i64: 32, 6>}]} {
    %c0 = arith.constant 0 : index
    %c0_0 = arith.constant 0 : index
    %0 = vector.load %arg1[%c0, %c0_0] : memref<32x128xf32, #tpu.memory_space<vmem>>, vector<32x128xf32>
    %c0_1 = arith.constant 0 : index
    %c0_2 = arith.constant 0 : index
    %1 = vector.load %arg2[%c0_1, %c0_2] : memref<128x6xf32, #tpu.memory_space<vmem>>, vector<128x6xf32>
    %cst = arith.constant dense<0.000000e+00> : vector<32x6xf32>
    %2 = tpu.matmul %0, %1, %cst {dimension_numbers = #tpu.dot_dimension_numbers<[1], [0], [0], [1], [0, 0, 1, 1], [], []>} : vector<32x128xf32>, vector<128x6xf32>, vector<32x6xf32> -> vector<32x6xf32>
    %c0_3 = arith.constant 0 : index
    %c0_4 = arith.constant 0 : index
    %3 = vector.load %arg3[%c0_3, %c0_4] : memref<1x6xf32, #tpu.memory_space<vmem>>, vector<1x6xf32>
    %4 = vector.broadcast %3 : vector<1x6xf32> to vector<32x6xf32>
    %5 = arith.addf %2, %4 : vector<32x6xf32>
    %c0_5 = arith.constant 0 : index
    %c0_6 = arith.constant 0 : index
    %6 = vector.load %arg4[%c0_5, %c0_6] : memref<32x6xf32, #tpu.memory_space<vmem>>, vector<32x6xf32>
    tpu.vector_store %arg4[%c0_5, %c0_6], %5 {strides = array<i32>} : memref<32x6xf32, #tpu.memory_space<vmem>>, vector<32x6xf32>,
    return
  }
  func.func @transform_0(%arg0: i32) -> (i32, i32) {
    %c0_i32 = arith.constant 0 : i32
    %c0_i32_0 = arith.constant 0 : i32
    %c0_i32_1 = arith.constant 0 : i32
    return %c0_i32, %c0_i32_0 : i32, i32
  }
  func.func @transform_1(%arg0: i32) -> (i32, i32) {
    %c0_i32 = arith.constant 0 : i32
    %c0_i32_0 = arith.constant 0 : i32
    %c0_i32_1 = arith.constant 0 : i32
    return %c0_i32, %c0_i32_0 : i32, i32
  }
  func.func @transform_2(%arg0: i32) -> (i32, i32) {
    %c0_i32 = arith.constant 0 : i32
    %c0_i32_0 = arith.constant 0 : i32
    %c0_i32_1 = arith.constant 0 : i32
    return %c0_i32, %c0_i32_0 : i32, i32
  }
  func.func @transform_3(%arg0: i32) -> (i32, i32) {
    %c0_i32 = arith.constant 0 : i32
    %c0_i32_0 = arith.constant 0 : i32
    %c0_i32_1 = arith.constant 0 : i32
    return %c0_i32, %c0_i32_0 : i32, i32
  }
}

</mosaic_0001>

<bundles_post_ra>
// kernel: gtcn_forward.5
= control target key start
LH: loop header
LB: loop body
LE: loop exit
PB: predicated region body
PF: predicated region fallthrough
CT: control target
= control target key end

     0   :  { %vm126_vm0 = vcmask 48128   ;;  %s337_s1 = inlined_call_operand.vmem [shape: f32[128,6], index: 1, kind: input, shape index: {}]   ;;  %s338_s0 = inlined_call_operand.vmem [shape: f32[32,128], index: 0, kind: input, shape index: {}]   ;;  %s339_s2 = inlined_call_operand.vmem [shape: f32[1,6], index: 2, kind: input, shape index: {}]   ;;  %s340_s3 = inlined_call_operand.vmem [shape: f32[32,6], index: 3, kind: output, shape index: {}]  }
   0x1   :  { %v18_v0 = vld [vmem:[%s337_s1] sm:$0xff]  ;;  %v19_v1 = vld [vmem:[%s337_s1 + $0x8] sm:$0xff]  ;;  %v20_v2 = vld [vmem:[%s337_s1 + $0x10] sm:$0xff] }
   0x2   :  { %v194_v3 = vpack.c.bf16 %v19_v1, %v18_v0  ;;  %v21_v4 = vld [vmem:[%s337_s1 + $0x18] sm:$0xff]  ;;  %v22_v6 = vld [vmem:[%s337_s1 + $0x20] sm:$0xff]  ;;  %v23_v7 = vld [vmem:[%s337_s1 + $0x28] sm:$0xff] }
   0x3   :  { %v198_v5 = vpack.c.bf16 %v21_v4, %v20_v2  ;;  %v202_v8 = vpack.c.bf16 %v23_v7, %v22_v6  ;;  %v14_v9 = vld [vmem:[%s338_s0] sm:$0xff]  ;;  %v16_v10 = vld [vmem:[%s338_s0 + $0x10] sm:$0xff]  ;;  %v25_v12 = vld [vmem:[%s337_s1 + $0x38] sm:$0xff] }
   0x4   :  { %195 = vmatprep.subr.bf16.mxu0 %v194_v3  ;;  %226 = vmatprep.subr.bf16.mxu1 %v194_v3  ;;  %v24_v11 = vld [vmem:[%s337_s1 + $0x30] sm:$0xff]  ;;  %v26_v14 = vld [vmem:[%s337_s1 + $0x40] sm:$0xff]  ;;  %v27_v15 = vld [vmem:[%s337_s1 + $0x48] sm:$0xff] }
   0x5   :  { %197 = vmatpush3.bf16.msra.mxu0 %v194_v3  ;;  %234 = vmatpush3.bf16.msra.mxu1 %v194_v3  ;;  %v206_v13 = vpack.c.bf16 %v25_v12, %v24_v11  ;;  %v210_v16 = vpack.c.bf16 %v27_v15, %v26_v14  ;;  %v28_v17 = vld [vmem:[%s337_s1 + $0x50] sm:$0xff]  ;;  %v29_v18 = vld [vmem:[%s337_s1 + $0x58] sm:$0xff]  ;;  %v30_v20 = vld [vmem:[%s337_s1 + $0x60] sm:$0xff] }
   0x6   :  { %199 = vmatprep.subr.bf16.mxu0 %v198_v5  ;;  %227 = vmatprep.subr.bf16.mxu1 %v198_v5  ;;  %v214_v19 = vpack.c.bf16 %v29_v18, %v28_v17  ;;  %v31_v21 = vld [vmem:[%s337_s1 + $0x68] sm:$0xff]  ;;  %v32_v23 = vld [vmem:[%s337_s1 + $0x70] sm:$0xff]  ;;  %v33_v24 = vld [vmem:[%s337_s1 + $0x78] sm:$0xff] }
   0x7   :  { %188 = vmatprep.mubr.f32.mxu0 %v14_v9  ;;  %191 = vmatprep.mubr.f32.mxu1 %v16_v10  ;;  %v218_v22 = vpack.c.bf16 %v31_v21, %v30_v20  ;;  %v222_v25 = vpack.c.bf16 %v33_v24, %v32_v23  ;;  %v15_v26 = vld [vmem:[%s338_s0 + $0x8] sm:$0xff]  ;;  %v17_v27 = vld [vmem:[%s338_s0 + $0x18] sm:$0xff]  ;;  %v135_v28 = vld [vmem:[%s339_s2] ss:$0 sm:$0xff] }
   0x9   :  { %201 = vmatpush3.bf16.msra.mxu0 %v198_v5  ;;  %235 = vmatpush3.bf16.msra.mxu1 %v198_v5 }
   0xa   :  { %203 = vmatprep.subr.bf16.mxu0 %v202_v8  ;;  %228 = vmatprep.subr.bf16.mxu1 %v202_v8 }
   0xd   :  { %205 = vmatpush3.bf16.msra.mxu0 %v202_v8  ;;  %236 = vmatpush3.bf16.msra.mxu1 %v202_v8 }
   0xe   :  { %207 = vmatprep.subr.bf16.mxu0 %v206_v13  ;;  %229 = vmatprep.subr.bf16.mxu1 %v206_v13 }
  0x11   :  { %209 = vmatpush3.bf16.msra.mxu0 %v206_v13  ;;  %237 = vmatpush3.bf16.msra.mxu1 %v206_v13 }
  0x12   :  { %211 = vmatprep.subr.bf16.mxu0 %v210_v16  ;;  %230 = vmatprep.subr.bf16.mxu1 %v210_v16 }
  0x15   :  { %213 = vmatpush3.bf16.msra.mxu0 %v210_v16  ;;  %238 = vmatpush3.bf16.msra.mxu1 %v210_v16 }
  0x16   :  { %215 = vmatprep.subr.bf16.mxu0 %v214_v19  ;;  %231 = vmatprep.subr.bf16.mxu1 %v214_v19 }
  0x19   :  { %217 = vmatpush3.bf16.msra.mxu0 %v214_v19  ;;  %239 = vmatpush3.bf16.msra.mxu1 %v214_v19 }
  0x1a   :  { %219 = vmatprep.subr.bf16.mxu0 %v218_v22  ;;  %232 = vmatprep.subr.bf16.mxu1 %v218_v22 }
  0x1d   :  { %221 = vmatpush3.bf16.msra.mxu0 %v218_v22  ;;  %240 = vmatpush3.bf16.msra.mxu1 %v218_v22 }
  0x1e   :  { %223 = vmatprep.subr.bf16.mxu0 %v222_v25  ;;  %233 = vmatprep.subr.bf16.mxu1 %v222_v25 }
  0x21   :  { %225 = vmatpush3.bf16.msra.mxu0 %v222_v25  ;;  %241 = vmatpush3.bf16.msra.mxu1 %v222_v25 }
  0x24   :  { %189 = vmatmul.mubr.f32.vlgmr.msra.gmra.mrb[0].mxu0 %v15_v26  ;;  %192 = vmatmul.mubr.f32.vlgmr.msra.gmra.mrb[0].mxu1 %v17_v27 }
  0xf7   :  { %v190_v29 = vpop.f32.mrb[0].mxu0  ;;  %v193_v30 = vpop.f32.mrb[0].mxu1 }
  0xf8   :  { %v113_v31 = vadd.f32 %v190_v29, %v135_v28  ;;  %v123_v32 = vadd.f32 %v193_v30, %v135_v28  ;;  %v107_v33 = vpop.f32.mrb[1].mxu0  ;;  %v117_v34 = vpop.f32.mrb[1].mxu1 }
  0xf9   :  { %v108_v35 = vadd.f32 %v135_v28, %v107_v33  ;;  %v118_v36 = vadd.f32 %v135_v28, %v117_v34 }
  0xfa   :  { %128 = vst.msk [vmem:[%s340_s3 + $0x8] sm:$0xff] %vm126_vm0, %v113_v31  ;;  %130 = vst.msk [vmem:[%s340_s3 + $0x18] sm:$0xff] %vm126_vm0, %v123_v32 }
  0xfb   :  { %127 = vst.msk [vmem:[%s340_s3] sm:$0xff] %vm126_vm0, %v108_v35  ;;  %129 = vst.msk [vmem:[%s340_s3 + $0x10] sm:$0xff] %vm126_vm0, %v118_v36 }

// kernel: gtcn_forward.4
= control target key start
LH: loop header
LB: loop body
LE: loop exit
PB: predicated region body
PF: predicated region fallthrough
CT: control target
= control target key end

     0   :  { %s1262_s21 = smov 0   ;;  %s1264_s22 = smov 0   ;;  %s1387_s0 = inlined_call_operand.vmem [shape: f32[4,4,8,32], index: 0, kind: input, shape index: {}]   ;;  %s1388_s1 = inlined_call_operand.vmem [shape: f32[4,8,4,32], index: 1, kind: input, shape index: {}]   ;;  %s1389_s2 = inlined_call_operand.vmem [shape: f32[8,2,8], index: 2, kind: input, shape index: {}]   ;;  %s1390_s3 = inlined_call_operand.vmem [shape: f32[4,4,2], index: 3, kind: input, shape index: {}]   ;;  %s1391_s4 = inlined_call_operand.vmem [shape: f32[4,1], index: 4, kind: input, shape index: {}]   ;;  %s1392_s5 = inlined_call_operand.vmem [shape: f32[4,32], index: 5, kind: input, shape index: {}]   ;;  %s1393_s6 = inlined_call_operand.vmem [shape: f32[4,8,4,32], index: 6, kind: output, shape index: {}]  }
   0x1   :  { %s1266_s23 = smov 0   ;;  %s1268_s24 = smov 0  }
   0x2   :  { %s1270_s25 = smov 0  }
   0x3 LB: > { %s25_s26 = sadd.s32 1, %s1214_s23  ;;  %s28_s27 = sadd.s32 1, %s1218_s24  ;;  %s1222_s25 = sphi %s1270_s25, %s16_s25   ;;  %s1218_s24 = sphi %s1268_s24, %s1397_s24   ;;  %s1214_s23 = sphi %s1266_s23, %s1396_s23   ;;  %s1210_s22 = sphi %s1264_s22, %s1395_s22   ;;  %s1206_s21 = sphi %s1262_s21, %s1394_s21  }
   0x4   : > { %p26_p0 = scmp.ge.s32.totalorder %s25_s26, 8  ;;  %p1055_p1 = scmp.ge.s32.totalorder %s1222_s25, 1 }
   0x5   : > { %p250_p2 = scmp.lt.s32.totalorder %s1222_s25, 33 }
   0x6   : > { %s1399_s26 = smov (%p26_p0, %s25_s26), 0  ;;  %s1401_s27 = smov (!%p26_p0, %s28_s27), %s1218_s24 }
   0x7   : > { %p251_p3 = pnand %p1055_p1, %p250_p2  ;;  %p30_p4 = scmp.ge.s32.totalorder %s1401_s27, 4 }
   0x8   : > { %p295_p5 = scmp.lt.s32.totalorder (!%p251_p3), %s1210_s22, 3  ;;  %p302_p6 = scmp.lt.s32.totalorder (!%p251_p3), %s1206_s21, 7  ;;  %v1224_v0 = vmov (!%p251_p3), 0.0   ;;  %vm1225_vm0 = vmmov (!%p251_p3), 0   ;;  %vm322_vm1 = vcmask (!%p251_p3), 64512   ;;  %vm475_vm2 = vcmask (!%p251_p3), 1041408  }
   0x9   : > { %s1403_s27 = smov (%p30_p4, %s1401_s27), 0  ;;  %254 = sbr.rel (%p251_p3) target bundleno = 678 (0x2a6), region = 44 }
   0xa   : > { %1100 = vmatprep.subr.mxu0 (!%p251_p3), %v1224_v0  ;;  %1105 = vmatprep.subr.mxu1 (!%p251_p3), %v1224_v0  ;;  %v1066_v4 = vld [vmem:[%s1390_s3 + $0x4] sm:$0xf] (!%p251_p3)  ;;  %vm471_vm3 = vcmask (!%p251_p3), 15360   ;;  %v396_v5 = vld [vmem:[%s1390_s3] sm:$0xf] (!%p251_p3)  ;;  %v1226_v13 = vmov (!%p251_p3), 0  }
   0xb   : > { %1102 = vmatprep.mubr.msk.f32.mxu0 (!%p251_p3), %vm1225_vm0, %v1224_v0  ;;  %1107 = vmatprep.mubr.msk.f32.mxu1 (!%p251_p3), %vm1225_vm0, %v1224_v0  ;;  %v927_v12 = vld [vmem:[%s1391_s4] sm:$0xf] (!%p251_p3)  ;;  %v1073_v19 = vld [vmem:[%s1390_s3 + $0x8] sm:$0xf] (!%p251_p3)  ;;  %v1078_v22 = vld [vmem:[%s1390_s3 + $0xc] sm:$0xf] (!%p251_p3) }
   0xc   : > { %1183 = vset.pattern.permute.xlu0 (!%p251_p3), %v1226_v13  ;;  %v936_v35 = vld [vmem:[%s1392_s5] sm:$0xf] (!%p251_p3)  ;;  %vm939_vm4 = vcmask (!%p251_p3), 257024  }
   0xd   : > { %930 = vperm.xlu0 (!%p251_p3), %1183, %v927_v12  }
  0x10   : > { %s1405_s22 = smov (!%p295_p5, %s1210_s22), 3  ;;  %s1407_s21 = smov (!%p302_p6, %s1206_s21), 7 }
  0x11   : > { %s1083_s28 = sshll.u32 %s1405_s22, 5  ;;  %s1060_s8 = sshll.u32 %s1407_s21, 1 }
  0x12   : > { %s1306_s7 = scalar_lea.vmem %s1387_s0, %s1083_s28  ;;  %s311_s11 = scalar_lea.vmem %s1389_s2, %s1060_s8 }
  0x13   : > { %v321_v1 = vld [vmem:[%s1306_s7] sm:$0xff]  ;;  %v1064_v2 = vld [vmem:[%s1306_s7 + $0x8] sm:$0xff]  ;;  %v1071_v9 = vld [vmem:[%s1306_s7 + $0x10] sm:$0xff]  ;;  %s1058_s29 = sshll.u32 %s1405_s22, 3 }
  0x14   : > { %1101 = vmatpush3.msra.mxu0 %v321_v1  ;;  %1106 = vmatpush3.msra.mxu1 %v1064_v2  ;;  %v320_v3 = vld [vmem:[%s311_s11] sm:$0x3]  ;;  %v1076_v11 = vld [vmem:[%s1306_s7 + $0x18] sm:$0xff]  ;;  %s305_s30 = sadd.s32 %s1058_s29, %s1407_s21 }
  0x15   : > { %1103 = vmatmul.mubr.msk.f32.vlgmr.msra.gmra.mrb[0].mxu0 %vm322_vm1, %v320_v3  ;;  %1108 = vmatmul.mubr.msk.f32.vlgmr.msra.gmra.mrb[0].mxu1 %vm322_vm1, %v320_v3  ;;  %s1059_s7 = sshll.u32 %s305_s30, 2 }
  0x16   : > { %1110 = vmatprep.subr.mxu0 %v1224_v0  ;;  %1115 = vmatprep.subr.mxu1 %v1224_v0  ;;  %s307_s10 = scalar_lea.vmem %s1388_s1, %s1059_s7  ;;  %s319_s13 = scalar_lea.vmem %s1393_s6, %s1059_s7 }
  0x17   : > { %1112 = vmatprep.mubr.msk.f32.mxu0 %vm1225_vm0, %v1224_v0  ;;  %1117 = vmatprep.mubr.msk.f32.mxu1 %vm1225_vm0, %v1224_v0  ;;  %v934_v32 = vld [vmem:[%s307_s10] sm:$0xf] }
  0x8c   : > { %v931_v29 = vpop.permute.xlu0 %930 }
  0xe8   : > { %v392_v6 = vpop.f32.mrb[0].mxu0  ;;  %v465_v7 = vpop.f32.mrb[0].mxu1 }
  0xe9   : > { %v1109_v8 = vpop.f32.mrb[1].mxu1  ;;  %1111 = vmatpush3.msk.msra.mxu0 %vm475_vm2, %v465_v7  ;;  %1116 = vmatpush3.msk.msra.mxu1 %vm475_vm2, %v392_v6  ;;  %v1104_v10 = vpop.f32.mrb[1].mxu0 }
  0xea   : > { %1113 = vmatmul.mubr.msk.f32.vlgmr.msra.gmra.mrb[2].mxu0 %vm471_vm3, %v1066_v4  ;;  %1118 = vmatmul.mubr.msk.f32.vlgmr.msra.gmra.mrb[2].mxu1 %vm471_vm3, %v396_v5 }
  0xeb   : > { %1120 = vmatprep.subr.mxu0 %v1224_v0  ;;  %1122 = vmatprep.mubr.msk.f32.mxu0 %vm1225_vm0, %v1224_v0 }
  0xec   : > { %1121 = vmatpush3.msra.mxu0 %v1071_v9  ;;  %1125 = vmatprep.subr.mxu1 %v1224_v0 }
  0xed   : > { %1130 = vmatprep.subr.mxu0 %v1224_v0  ;;  %1127 = vmatprep.mubr.msk.f32.mxu1 %vm1225_vm0, %v1224_v0 }
  0xee   : > { %1123 = vmatmul.mubr.msk.f32.vlgmr.msra.gmra.mrb[4].mxu0 %vm322_vm1, %v320_v3 }
  0xef   : > { %1131 = vmatpush3.msra.mxu0 %v1076_v11  ;;  %1132 = vmatprep.mubr.msk.f32.mxu0 %vm1225_vm0, %v1224_v0 }
  0xf2   : > { %1133 = vmatmul.mubr.msk.f32.vlgmr.msra.gmra.mrb[6].mxu0 %vm322_vm1, %v320_v3 }
 0x1bd   : > { %v545_v14 = vpop.f32.mrb[2].mxu0  ;;  %v621_v15 = vpop.f32.mrb[2].mxu1 }
 0x1be   : > { %v622_v16 = vadd.f32 %v621_v15, %v545_v14  ;;  %v1114_v17 = vpop.f32.mrb[3].mxu0  ;;  %v1119_v18 = vpop.f32.mrb[3].mxu1 }
 0x1c1   : > { %v693_v20 = vpop.f32.mrb[4].mxu0 }
 0x1c2   : > { %v1124_v21 = vpop.f32.mrb[5].mxu0  ;;  %1126 = vmatpush3.msk.msra.mxu1 %vm475_vm2, %v693_v20 }
 0x1c3   : > { %1128 = vmatmul.mubr.msk.f32.vlgmr.msra.gmra.mrb[4].mxu1 %vm471_vm3, %v1073_v19  ;;  %1135 = vmatprep.subr.mxu1 %v1224_v0 }
 0x1c4   : > { %1137 = vmatprep.mubr.msk.f32.mxu1 %vm1225_vm0, %v1224_v0 }
 0x1c5   : > { %v844_v23 = vpop.f32.mrb[6].mxu0 }
 0x1c6   : > { %v1134_v24 = vpop.f32.mrb[7].mxu0  ;;  %1136 = vmatpush3.msk.msra.mxu1 %vm475_vm2, %v844_v23 }
 0x1c7   : > { %1138 = vmatmul.mubr.msk.f32.vlgmr.msra.gmra.mrb[6].mxu1 %vm471_vm3, %v1078_v22 }
 0x296   : > { %v771_v25 = vpop.f32.mrb[4].mxu1 }
 0x297   : > { %v775_v26 = vadd.f32 %v771_v25, %v622_v16  ;;  %v1129_v27 = vpop.f32.mrb[5].mxu1 }
 0x29a   : > { %v922_v28 = vpop.f32.mrb[6].mxu1 }
 0x29b   : > { %v926_v30 = vadd.f32 %v922_v28, %v775_v26  ;;  %v1139_v31 = vpop.f32.mrb[7].mxu1 }
 0x29d   : > { %v933_v33 = vadd.f32 %v931_v29, %v926_v30 }
 0x29f   : > { %v935_v34 = vadd.f32 %v934_v32, %v933_v33 }
 0x2a1   : > { %v937_v36 = vmax.f32 %v935_v34, 0.0 }
 0x2a3   : > { %v938_v37 = vmul.f32 %v937_v36, %v936_v35 }
 0x2a5   : > { %940 = vst.msk [vmem:[%s319_s13] sm:$0xf] %vm939_vm4, %v938_v37 }
 0x2a6 PF: > { %s16_s25 = sadd.s32 1, %s1222_s25   ;;  %s1394_s21 = smov %s1214_s23 }
 0x2a7   : > { %p13_p7 = scmp.ge.s32.totalorder %s16_s25, 34   ;;  %s1395_s22 = smov %s1218_s24 }
 0x2a8   : > { %s1396_s23 = smov %s1399_s26  ;;  %s1397_s24 = smov %s1403_s27 }
 0x2a9   :  { %15 = sbr.rel (!%p13_p7) target bundleno = 3 (0x3), region = 86 }

// kernel: gtcn_forward.3
= control target key start
LH: loop header
LB: loop body
LE: loop exit
PB: predicated region body
PF: predicated region fallthrough
CT: control target
= control target key end

     0   :  { %s2049_s25 = smov 0   ;;  %s2051_s26 = smov 0   ;;  %s2251_s0 = inlined_call_operand.vmem [shape: f32[4,8,3,32], index: 0, kind: input, shape index: {}]   ;;  %s2252_s1 = inlined_call_operand.vmem [shape: f32[3,8,3], index: 1, kind: input, shape index: {}]   ;;  %s2253_s2 = inlined_call_operand.vmem [shape: f32[8,1], index: 2, kind: input, shape index: {}]   ;;  %s2254_s3 = inlined_call_operand.vmem [shape: f32[3,8,8], index: 3, kind: input, shape index: {}]   ;;  %s2255_s4 = inlined_call_operand.vmem [shape: f32[8,1], index: 4, kind: input, shape index: {}]   ;;  %s2256_s5 = inlined_call_operand.vmem [shape: f32[8,3], index: 5, kind: input, shape index: {}]   ;;  %s2257_s6 = inlined_call_operand.vmem [shape: f32[8,1], index: 6, kind: input, shape index: {}]   ;;  %s2258_s7 = inlined_call_operand.vmem [shape: f32[3,4,8], index: 7, kind: input, shape index: {}]   ;;  %s2259_s8 = inlined_call_operand.vmem [shape: f32[4,1], index: 8, kind: input, shape index: {}]   ;;  %s2260_s9 = inlined_call_operand.vmem [shape: f32[3,4,4], index: 9, kind: input, shape index: {}]   ;;  %s2261_s10 = inlined_call_operand.vmem [shape: f32[4,1], index: 10, kind: input, shape index: {}]   ;;  %s2262_s11 = inlined_call_operand.vmem [shape: f32[4,8], index: 11, kind: input, shape index: {}]   ;;  %s2263_s12 = inlined_call_operand.vmem [shape: f32[4,1], index: 12, kind: input, shape index: {}]   ;;  %s2264_s13 = inlined_call_operand.vmem [shape: f32[4,8,4,32], index: 13, kind: output, shape index: {}]  }
   0x1   :  { %s2053_s27 = smov 0   ;;  %s2055_s28 = smov 0  }
   0x2   :  { %s2057_s29 = smov 0  }
   0x3 LB: > { %s32_s30 = sadd.s32 1, %s1961_s27  ;;  %s35_s14 = sadd.s32 1, %s1965_s28  ;;  %s1969_s29 = sphi %s2057_s29, %s23_s29   ;;  %s1965_s28 = sphi %s2055_s28, %s2268_s28   ;;  %s1961_s27 = sphi %s2053_s27, %s2267_s27   ;;  %s1957_s26 = sphi %s2051_s26, %s2266_s26   ;;  %s1953_s25 = sphi %s2049_s25, %s2265_s25  }
   0x4   : > { %p33_p0 = scmp.ge.s32.totalorder %s32_s30, 8  ;;  %p1739_p1 = scmp.ge.s32.totalorder %s1969_s29, 1 }
   0x5   : > { %p406_p2 = scmp.lt.s32.totalorder %s1969_s29, 33 }
   0x6   : > { %s2270_s30 = smov (%p33_p0, %s32_s30), 0  ;;  %s2272_s14 = smov (!%p33_p0, %s35_s14), %s1965_s28 }
   0x7   : > { %p407_p3 = pnand %p1739_p1, %p406_p2  ;;  %p37_p4 = scmp.ge.s32.totalorder %s2272_s14, 4 }
   0x8   : > { %p456_p5 = scmp.lt.s32.totalorder (!%p407_p3), %s1957_s26, 3  ;;  %p458_p6 = scmp.lt.s32.totalorder (!%p407_p3), %s1953_s25, 7  ;;  %vm473_vm0 = vcmask (!%p407_p3), 10240   ;;  %v1971_v0 = vmov (!%p407_p3), 0.0   ;;  %vm1973_vm1 = vmmov (!%p407_p3), 0   ;;  %vm479_vm2 = vcmask (!%p407_p3), 272400  }
   0x9   : > { %s2274_s14 = smov (%p37_p4, %s2272_s14), 0  ;;  %410 = sbr.rel (%p407_p3) target bundleno = 1911 (0x777), region = 72 }
   0xa   : > { %474 = vst.msk [vmem:[#allocation2] sm:$0x7] (!%p407_p3), %vm473_vm0, %v1971_v0  ;;  %1808 = vmatprep.subr.mxu1 (!%p407_p3), %v1971_v0  ;;  %1803 = vmatprep.subr.mxu0 (!%p407_p3), %v1971_v0  ;;  %s1972_s21 = smov (!%p407_p3), 2   ;;  %v1974_v3 = vmov (!%p407_p3), 0   ;;  %vm492_vm3 = vcmask (!%p407_p3), 1042432   ;;  %vm488_vm4 = vcmask (!%p407_p3), 23552  }
   0xb   : > { %1805 = vmatprep.mubr.msk.f32.mxu0 (!%p407_p3), %vm1973_vm1, %v1971_v0  ;;  %1810 = vmatprep.mubr.msk.f32.mxu1 (!%p407_p3), %vm1973_vm1, %v1971_v0  ;;  %v481_v5 = vld [vmem:[%s2252_s1] sm:$0xff] (!%p407_p3)  ;;  %s1975_s24 = smov (!%p407_p3), 126   ;;  %v1744_v7 = vld [vmem:[%s2252_s1 + $0x8] sm:$0xff] (!%p407_p3)  ;;  %v1749_v10 = vld [vmem:[%s2252_s1 + $0x10] sm:$0xff] (!%p407_p3)  ;;  %vm728_vm5 = vcmask (!%p407_p3), 15360   ;;  %vm734_vm6 = vcmask (!%p407_p3), 277520  }
   0xc   : > { %1921 = vset.pattern.permute.xlu1 (!%p407_p3), %v1974_v3  ;;  %1922 = vset.pattern.permute.xlu0 (!%p407_p3), %v1974_v3  ;;  %v720_v6 = vld [vmem:[%s2253_s2] sm:$0xff] (!%p407_p3)  ;;  %729 = vst.msk [vmem:[#allocation3] sm:$0xff] (!%p407_p3), %vm728_vm5, %v1971_v0  ;;  %vm744_vm7 = vcmask (!%p407_p3), 64512   ;;  %v1752_v28 = vld [vmem:[%s2254_s3 + $0x8] sm:$0xff] (!%p407_p3)  ;;  %v1755_v31 = vld [vmem:[%s2254_s3 + $0x10] sm:$0xff] (!%p407_p3)  ;;  %vm1062_vm8 = vcmask (!%p407_p3), 31744  }
   0xd   : > { %v736_v24 = vld [vmem:[%s2254_s3] sm:$0xff] (!%p407_p3)  ;;  %1063 = vst.msk [vmem:[#allocation4] sm:$0xff] (!%p407_p3), %vm1062_vm8, %v1971_v0  ;;  %s1977_s18 = smov (!%p407_p3), 4   ;;  %vm1068_vm9 = vcmask (!%p407_p3), 293920   ;;  %v1762_v56 = vld [vmem:[%s2258_s7 + $0x8] sm:$0xf] (!%p407_p3) }
   0xe   : > { %v970_v25 = vld [vmem:[%s2255_s4] sm:$0xff] (!%p407_p3)  ;;  %vm1311_vm10 = vcmask (!%p407_p3), 27648   ;;  %vm1317_vm11 = vcmask (!%p407_p3), 289824   ;;  %vm1329_vm12 = vcmask (!%p407_p3), 1043456   ;;  %vm1647_vm13 = vcmask (!%p407_p3), 257024  }
   0xf   : > { %v978_v26 = vld [vmem:[%s2256_s5] sm:$0xff] (!%p407_p3)  ;;  %1312 = vst.msk [vmem:[#allocation5] sm:$0xf] (!%p407_p3), %vm1311_vm10, %v1971_v0 }
  0x10   : > { %s2276_s26 = smov (!%p456_p5, %s1957_s26), 3  ;;  %s2278_s25 = smov (!%p458_p6, %s1953_s25), 7  ;;  %v979_v27 = vld [vmem:[%s2257_s6] sm:$0xff] }
  0x11   : > { %s1740_s15 = sshll.u32 %s2276_s26, 3  ;;  %v1070_v51 = vld [vmem:[%s2258_s7] sm:$0xf]  ;;  %v1759_v53 = vld [vmem:[%s2258_s7 + $0x4] sm:$0xf] }
  0x12   : > { %s2082_s16 = sadd.s32 %s1740_s15, %s2278_s25  ;;  %s1976_s25 = smov 127   ;;  %v1303_v52 = vld [vmem:[%s2259_s8] sm:$0xf] }
  0x13   : > { %s1741_s17 = sshll.u32 %s2082_s16, 2 }
  0x14   : > { %s463_s20 = scalar_lea.vmem %s2251_s0, %s1741_s17 }
  0x15   : > { %v2090_v1 = vld [vmem:[%s463_s20] sm:$0x7] }
  0x16   : > { %476 = vrot.lane.b32.xlu0 %v2090_v1, %s1972_s21 }
  0x88   : > { %v477_v2 = vpop.permute.xlu0 %476 }
  0x89   : > { %480 = vst.msk [vmem:[#allocation2] sm:$0x7] %vm479_vm2, %v477_v2 }
  0x90   : > { %v482_v4 = vld [vmem:[#allocation2] sm:$0x7] }
  0x91   : > { %642 = vrot.lane.b32.xlu1 %v482_v4, %s1975_s24  ;;  %486 = vrot.lane.b32.xlu0 %v482_v4, %s1976_s25 }
  0x92   : > { %1809 = vmatpush3.msk.msra.mxu1 %vm492_vm3, %v482_v4 }
  0x93   : > { %1811 = vmatmul.mubr.msk.f32.vlgmr.msra.gmra.mrb[0].mxu1 %vm488_vm4, %v481_v5  ;;  %1818 = vmatprep.subr.mxu1 %v1971_v0 }
  0x94   : > { %1820 = vmatprep.mubr.msk.f32.mxu1 %vm1973_vm1, %v1971_v0 }
  0x95   : > { %723 = vperm.xlu1 %1921, %v720_v6  }
 0x103   : > { %v487_v8 = vpop.permute.xlu0 %486  ;;  %v643_v9 = vpop.permute.xlu1 %642 }
 0x104   : > { %1804 = vmatpush3.msk.msra.mxu0 %vm492_vm3, %v487_v8  ;;  %v1566_v8 = vld [vmem:[%s2263_s12] sm:$0xf] }
 0x105   : > { %1806 = vmatmul.mubr.msk.f32.vlgmr.msra.gmra.mrb[0].mxu0 %vm488_vm4, %v1744_v7  ;;  %1813 = vmatprep.subr.mxu0 %v1971_v0  ;;  %v1319_v7 = vld [vmem:[%s2260_s9] sm:$0xf] }
 0x106   : > { %1814 = vmatpush3.msk.msra.mxu0 %vm492_vm3, %v643_v9  ;;  %1815 = vmatprep.mubr.msk.f32.mxu0 %vm1973_vm1, %v1971_v0  ;;  %v1557_v9 = vld [vmem:[%s2261_s10] sm:$0xf] }
 0x107   : > { %1823 = vmatprep.subr.mxu0 %v1971_v0 }
 0x109   : > { %1816 = vmatmul.mubr.msk.f32.vlgmr.msra.gmra.mrb[2].mxu0 %vm488_vm4, %v1749_v10  ;;  %v1565_v10 = vld [vmem:[%s2262_s11] sm:$0xf] }
 0x10a   : > { %1825 = vmatprep.mubr.msk.f32.mxu0 %vm1973_vm1, %v1971_v0 }
 0x114   : > { %v724_v17 = vpop.permute.xlu1 %723 }
 0x166   : > { %v636_v11 = vpop.f32.mrb[0].mxu1 }
 0x167   : > { %v1812_v12 = vpop.f32.mrb[1].mxu1 }
 0x1d8   : > { %v561_v13 = vpop.f32.mrb[0].mxu0 }
 0x1d9   : > { %v637_v14 = vadd.f32 %v636_v11, %v561_v13  ;;  %v1807_v15 = vpop.f32.mrb[1].mxu0  ;;  %v1764_v11 = vld [vmem:[%s2260_s9 + $0x4] sm:$0xf] }
 0x1dc   : > { %v715_v16 = vpop.f32.mrb[2].mxu0 }
 0x1dd   : > { %v719_v18 = vadd.f32 %v715_v16, %v637_v14  ;;  %v1817_v19 = vpop.f32.mrb[3].mxu0  ;;  %v1769_v14 = vld [vmem:[%s2260_s9 + $0x8] sm:$0xf] }
 0x1df   : > { %v726_v20 = vadd.f32 %v724_v17, %v719_v18 }
 0x1e1   : > { %1923 = vtanh.f32 %v726_v20 }
 0x1eb   : > { %v1924_v21 = vpop.eup %1923 }
 0x1ec   : > { %731 = vrot.lane.b32.xlu0 %v1924_v21, %s1972_s21 }
 0x25e   : > { %v732_v22 = vpop.permute.xlu0 %731 }
 0x25f   : > { %735 = vst.msk [vmem:[#allocation3] sm:$0xff] %vm734_vm6, %v732_v22 }
 0x266   : > { %v737_v23 = vld [vmem:[#allocation3] sm:$0xff] }
 0x267   : > { %893 = vrot.lane.b32.xlu0 %v737_v23, %s1975_s24  ;;  %741 = vrot.lane.b32.xlu1 %v737_v23, %s1976_s25  ;;  %s1978_s25 = smov 124  }
 0x268   : > { %1824 = vmatpush3.msra.mxu0 %v737_v23 }
 0x269   : > { %1826 = vmatmul.mubr.msk.f32.vlgmr.msra.gmra.mrb[4].mxu0 %vm744_vm7, %v736_v24  ;;  %1833 = vmatprep.subr.mxu0 %v1971_v0 }
 0x26a   : > { %1834 = vmatpush3.msk.msra.mxu0 %vm492_vm3, %v2090_v1  ;;  %1835 = vmatprep.mubr.msk.f32.mxu0 %vm1973_vm1, %v1971_v0 }
 0x26b   : > { %973 = vperm.xlu1 %1921, %v970_v25   ;;  %982 = vperm.xlu0 %1922, %v979_v27  }
 0x26c   : > { %1843 = vmatprep.subr.mxu0 %v1971_v0 }
 0x26d   : > { %1836 = vmatmul.mubr.msk.f32.vlgmr.msra.gmra.mrb[6].mxu0 %vm488_vm4, %v978_v26 }
 0x26e   : > { %1845 = vmatprep.mubr.msk.f32.mxu0 %vm1973_vm1, %v1971_v0 }
 0x2d9   : > { %v742_v29 = vpop.permute.xlu1 %741  ;;  %v894_v30 = vpop.permute.xlu0 %893 }
 0x2da   : > { %1819 = vmatpush3.msra.mxu1 %v742_v29 }
 0x2db   : > { %1821 = vmatmul.mubr.msk.f32.vlgmr.msra.gmra.mrb[2].mxu1 %vm744_vm7, %v1752_v28  ;;  %1828 = vmatprep.subr.mxu1 %v1971_v0 }
 0x2dc   : > { %1829 = vmatpush3.msra.mxu1 %v894_v30  ;;  %1830 = vmatprep.mubr.msk.f32.mxu1 %vm1973_vm1, %v1971_v0 }
 0x2dd   : > { %1838 = vmatprep.subr.mxu1 %v1971_v0 }
 0x2df   : > { %1831 = vmatmul.mubr.msk.f32.vlgmr.msra.gmra.mrb[4].mxu1 %vm744_vm7, %v1755_v31 }
 0x2e0   : > { %1840 = vmatprep.mubr.msk.f32.mxu1 %vm1973_vm1, %v1971_v0 }
 0x2ea   : > { %v974_v42 = vpop.permute.xlu1 %973  ;;  %v983_v44 = vpop.permute.xlu0 %982 }
 0x33c   : > { %v887_v32 = vpop.f32.mrb[4].mxu0 }
 0x33d   : > { %v1827_v33 = vpop.f32.mrb[5].mxu0 }
 0x340   : > { %v1056_v34 = vpop.f32.mrb[6].mxu0 }
 0x341   : > { %v1837_v35 = vpop.f32.mrb[7].mxu0  ;;  %v1057_v45 = vadd.f32 %v1056_v34, %v983_v44 }
 0x3ae   : > { %v814_v36 = vpop.f32.mrb[2].mxu1 }
 0x3af   : > { %v888_v37 = vadd.f32 %v887_v32, %v814_v36  ;;  %v1822_v38 = vpop.f32.mrb[3].mxu1 }
 0x3b2   : > { %v965_v39 = vpop.f32.mrb[4].mxu1 }
 0x3b3   : > { %v969_v40 = vadd.f32 %v965_v39, %v888_v37  ;;  %v1832_v41 = vpop.f32.mrb[5].mxu1 }
 0x3b5   : > { %v976_v43 = vadd.f32 %v974_v42, %v969_v40 }
 0x3b7   : > { %1925 = vtanh.f32 %v976_v43 }
 0x3c1   : > { %v1926_v46 = vpop.eup %1925 }
 0x3c2   : > { %v1060_v47 = vadd.f32 %v1926_v46, %v1057_v45 }
 0x3c4   : > { %v1061_v48 = vmax.f32 %v1060_v47, 0.0 }
 0x3c6   : > { %1065 = vrot.lane.b32.xlu1 %v1061_v48, %s1977_s18 }
 0x438   : > { %v1066_v49 = vpop.permute.xlu1 %1065 }
 0x439   : > { %1069 = vst.msk [vmem:[#allocation4] sm:$0xff] %vm1068_vm9, %v1066_v49 }
 0x440   : > { %v1071_v50 = vld [vmem:[#allocation4] sm:$0xff] }
 0x441   : > { %1226 = vrot.lane.b32.xlu0 %v1071_v50, %s1978_s25  ;;  %1075 = vrot.lane.b32.xlu1 %v1071_v50, %s1975_s24 }
 0x442   : > { %1844 = vmatpush3.msra.mxu0 %v1071_v50 }
 0x443   : > { %1846 = vmatmul.mubr.msk.f32.vlgmr.msra.gmra.mrb[8].mxu0 %vm744_vm7, %v1070_v51  ;;  %1853 = vmatprep.subr.mxu0 %v1971_v0 }
 0x444   : > { %1855 = vmatprep.mubr.msk.f32.mxu0 %vm1973_vm1, %v1971_v0 }
 0x445   : > { %1306 = vperm.xlu1 %1921, %v1303_v52  }
 0x4b3   : > { %v1076_v54 = vpop.permute.xlu1 %1075  ;;  %v1227_v55 = vpop.permute.xlu0 %1226 }
 0x4b4   : > { %1839 = vmatpush3.msra.mxu1 %v1076_v54 }
 0x4b5   : > { %1841 = vmatmul.mubr.msk.f32.vlgmr.msra.gmra.mrb[6].mxu1 %vm744_vm7, %v1759_v53  ;;  %1848 = vmatprep.subr.mxu1 %v1971_v0 }
 0x4b6   : > { %1849 = vmatpush3.msra.mxu1 %v1227_v55  ;;  %1850 = vmatprep.mubr.msk.f32.mxu1 %vm1973_vm1, %v1971_v0 }
 0x4b7   : > { %1858 = vmatprep.subr.mxu1 %v1971_v0 }
 0x4b9   : > { %1851 = vmatmul.mubr.msk.f32.vlgmr.msra.gmra.mrb[8].mxu1 %vm744_vm7, %v1762_v56 }
 0x4ba   : > { %1860 = vmatprep.mubr.msk.f32.mxu1 %vm1973_vm1, %v1971_v0 }
 0x4c4   : > { %v1307_v2 = vpop.permute.xlu1 %1306 }
 0x516   : > { %v1220_v57 = vpop.f32.mrb[8].mxu0 }
 0x517   : > { %v1847_v58 = vpop.f32.mrb[9].mxu0 }
 0x588   : > { %v1147_v59 = vpop.f32.mrb[6].mxu1 }
 0x589   : > { %v1221_v60 = vadd.f32 %v1220_v57, %v1147_v59  ;;  %v1842_v61 = vpop.f32.mrb[7].mxu1 }
 0x58c   : > { %v1298_v62 = vpop.f32.mrb[8].mxu1 }
 0x58d   : > { %v1302_v63 = vadd.f32 %v1298_v62, %v1221_v60  ;;  %v1852_v1 = vpop.f32.mrb[9].mxu1 }
 0x58f   : > { %v1309_v3 = vadd.f32 %v1307_v2, %v1302_v63 }
 0x591   : > { %1927 = vtanh.f32 %v1309_v3 }
 0x59b   : > { %v1928_v4 = vpop.eup %1927 }
 0x59c   : > { %1314 = vrot.lane.b32.xlu0 %v1928_v4, %s1977_s18  ;;  %s471_s18 = scalar_lea.vmem %s2264_s13, %s1741_s17 }
 0x60e   : > { %v1315_v5 = vpop.permute.xlu0 %1314 }
 0x60f   : > { %1318 = vst.msk [vmem:[#allocation5] sm:$0xf] %vm1317_vm11, %v1315_v5 }
 0x616   : > { %v1320_v6 = vld [vmem:[#allocation5] sm:$0xf] }
 0x617   : > { %1479 = vrot.lane.b32.xlu0 %v1320_v6, %s1978_s25  ;;  %1324 = vrot.lane.b32.xlu1 %v1320_v6, %s1975_s24 }
 0x618   : > { %1859 = vmatpush3.msk.msra.mxu1 %vm1329_vm12, %v1320_v6 }
 0x619   : > { %1861 = vmatmul.mubr.msk.f32.vlgmr.msra.gmra.mrb[10].mxu1 %vm1062_vm8, %v1319_v7  ;;  %1868 = vmatprep.subr.mxu1 %v1971_v0 }
 0x61a   : > { %1869 = vmatpush3.msra.mxu1 %v1061_v48  ;;  %1870 = vmatprep.mubr.msk.f32.mxu1 %vm1973_vm1, %v1971_v0 }
 0x61b   : > { %1569 = vperm.xlu0 %1922, %v1566_v8   ;;  %1560 = vperm.xlu1 %1921, %v1557_v9  }
 0x61d   : > { %1871 = vmatmul.mubr.msk.f32.vlgmr.msra.gmra.mrb[12].mxu1 %vm744_vm7, %v1565_v10 }
 0x689   : > { %v1325_v12 = vpop.permute.xlu1 %1324  ;;  %v1480_v13 = vpop.permute.xlu0 %1479 }
 0x68a   : > { %1854 = vmatpush3.msk.msra.mxu0 %vm1329_vm12, %v1325_v12 }
 0x68b   : > { %1856 = vmatmul.mubr.msk.f32.vlgmr.msra.gmra.mrb[10].mxu0 %vm1062_vm8, %v1764_v11  ;;  %1863 = vmatprep.subr.mxu0 %v1971_v0 }
 0x68c   : > { %1864 = vmatpush3.msk.msra.mxu0 %vm1329_vm12, %v1480_v13  ;;  %1865 = vmatprep.mubr.msk.f32.mxu0 %vm1973_vm1, %v1971_v0 }
 0x68f   : > { %1866 = vmatmul.mubr.msk.f32.vlgmr.msra.gmra.mrb[12].mxu0 %vm1062_vm8, %v1769_v14 }
 0x69a   : > { %v1561_v25 = vpop.permute.xlu1 %1560  ;;  %v1570_v0 = vpop.permute.xlu0 %1569 }
 0x6ec   : > { %v1473_v15 = vpop.f32.mrb[10].mxu1 }
 0x6ed   : > { %v1862_v16 = vpop.f32.mrb[11].mxu1 }
 0x6f0   : > { %v1641_v17 = vpop.f32.mrb[12].mxu1 }
 0x6f1   : > { %v1872_v18 = vpop.f32.mrb[13].mxu1  ;;  %v1642_v27 = vadd.f32 %v1641_v17, %v1570_v0 }
 0x75e   : > { %v1398_v19 = vpop.f32.mrb[10].mxu0 }
 0x75f   : > { %v1474_v20 = vadd.f32 %v1473_v15, %v1398_v19  ;;  %v1857_v21 = vpop.f32.mrb[11].mxu0 }
 0x762   : > { %v1552_v22 = vpop.f32.mrb[12].mxu0 }
 0x763   : > { %v1556_v23 = vadd.f32 %v1552_v22, %v1474_v20  ;;  %v1867_v24 = vpop.f32.mrb[13].mxu0 }
 0x765   : > { %v1563_v26 = vadd.f32 %v1561_v25, %v1556_v23 }
 0x767   : > { %1929 = vtanh.f32 %v1563_v26 }
 0x771   : > { %v1930_v28 = vpop.eup %1929 }
 0x772   : > { %v1645_v29 = vadd.f32 %v1930_v28, %v1642_v27 }
 0x774   : > { %v1646_v30 = vmax.f32 %v1645_v29, 0.0 }
 0x776   : > { %1648 = vst.msk [vmem:[%s471_s18] sm:$0xf] %vm1647_vm13, %v1646_v30 }
 0x777 PF: > { %s23_s29 = sadd.s32 1, %s1969_s29   ;;  %s2265_s25 = smov %s1961_s27 }
 0x778   : > { %p20_p7 = scmp.ge.s32.totalorder %s23_s29, 34   ;;  %s2266_s26 = smov %s1965_s28 }
 0x779   : > { %s2267_s27 = smov %s2270_s30  ;;  %s2268_s28 = smov %s2274_s14 }
 0x77a   :  { %22 = sbr.rel (!%p20_p7) target bundleno = 3 (0x3), region = 110 }

</bundles_post_ra>
